<compile_context>
chip_gen: v7x
topology: tpu7x:2x2x1
jax: 0.10.0
libtpu: 0.0.40
codegen_flags: <defaults>
</compile_context>

<pallas_src>
import functools

import jax
import jax.numpy as jnp
from jax.experimental import pallas as pl
from jax.experimental.pallas import tpu as pltpu


def _round_up(x, m):
    return ((x + m - 1) // m) * m


# ----------------------------------------------------------------------------
# Kernel 1: LightGCN propagation
# ----------------------------------------------------------------------------
def _lgcn_prop_kernel(g_ref, e0_ref, out_ref, e_buf, acc_ref, *, n_layers, tn, n_pad):
    l = pl.program_id(1)          # layer (sequential)
    i = pl.program_id(2)          # output row tile
    k = pl.program_id(3)          # reduction tile (innermost)
    nk = pl.num_programs(3)

    # Once per d-slab: load E_0 into the ping buffer and the layer-sum scratch.
    @pl.when(jnp.logical_and(l == 0, jnp.logical_and(i == 0, k == 0)))
    def _():
        e0 = e0_ref[...]
        e_buf[pl.ds(0, n_pad), :] = e0
        acc_ref[...] = e0

    cur = l % 2                   # slot holding E_l
    nxt = (l + 1) % 2             # slot receiving E_{l+1}

    src = pl.multiple_of(cur * n_pad + k * tn, tn)
    dst = pl.multiple_of(nxt * n_pad + i * tn, tn)

    # (tn, tn) bf16 x (tn, td) bf16 -> f32 partial product on the MXU.
    part = jnp.dot(
        g_ref[...],
        e_buf[pl.ds(src, tn), :].astype(jnp.bfloat16),
        preferred_element_type=jnp.float32,
    )

    @pl.when(k == 0)
    def _():
        e_buf[pl.ds(dst, tn), :] = part

    @pl.when(k != 0)
    def _():
        e_buf[pl.ds(dst, tn), :] += part

    # Row tile finished for this layer: fold E_{l+1} into the layer sum and
    # refresh the VMEM-resident output tile with the running mean. The write
    # at the last layer is the final value.
    @pl.when(k == nk - 1)
    def _():
        rows = pl.ds(pl.multiple_of(i * tn, tn), tn)
        acc_ref[rows, :] += e_buf[pl.ds(dst, tn), :]
        out_ref[...] = acc_ref[rows, :] * (1.0 / float(n_layers + 1))


def lightgcn_propagate(graph, all_emb, n_layers, *, tn=256, td=None):
    """graph: (N, N), all_emb: (N, D) -> mean([E_0 .. E_L]) as (N, D) f32."""
    n, d = all_emb.shape
    if n_layers <= 0:
        return all_emb.astype(jnp.float32)

    tn = min(tn, _round_up(n, 128))          # G tile (rows & reduction)
    if td is None:
        td = min(_round_up(d, 128), 512)     # lane-axis slab of E
    n_pad = _round_up(n, tn)
    d_pad = _round_up(d, td)

    # bf16 graph halves HBM traffic and doubles MXU rate; accumulation stays f32.
    g = jnp.pad(graph.astype(jnp.bfloat16), ((0, n_pad - n), (0, n_pad - n)))
    e0 = jnp.pad(all_emb.astype(jnp.float32), ((0, n_pad - n), (0, d_pad - d)))

    gd, gi, gk = d_pad // td, n_pad // tn, n_pad // tn
    kernel = functools.partial(
        _lgcn_prop_kernel, n_layers=n_layers, tn=tn, n_pad=n_pad)

    out = pl.pallas_call(
        kernel,
        out_shape=jax.ShapeDtypeStruct((n_pad, d_pad), jnp.float32),
        grid=(gd, n_layers, gi, gk),
        in_specs=[
            pl.BlockSpec((tn, tn), lambda dd, l, i, k: (i, k)),      # G tile (bf16)
            pl.BlockSpec((n_pad, td), lambda dd, l, i, k: (0, dd)),  # E_0 d-slab (resident)
        ],
        out_specs=pl.BlockSpec((tn, td), lambda dd, l, i, k: (i, dd)),
        scratch_shapes=[
            pltpu.VMEM((2 * n_pad, td), jnp.float32),   # E_l / E_{l+1} ping-pong
            pltpu.VMEM((n_pad, td), jnp.float32),       # sum_l E_l
        ],
        compiler_params=pltpu.CompilerParams(
            dimension_semantics=("parallel", "arbitrary", "arbitrary", "arbitrary"),
            vmem_limit_bytes=48 * 1024 * 1024,
        ),
    )(g, e0)
    return out[:n, :d]


# ----------------------------------------------------------------------------
# Kernel 2: fused batch gather + scoring  gamma[b] = <U[users[b]], I[items[b]]>
# ----------------------------------------------------------------------------
def _score_kernel(users_sref, items_sref, u_ref, i_ref, o_ref):
    # users_sref / items_sref live in SMEM and drive the row-gather index_maps.
    del users_sref, items_sref
    b = pl.program_id(0)

    @pl.when(b == 0)
    def _():
        o_ref[...] = jnp.zeros_like(o_ref)

    s = jnp.sum(u_ref[...] * i_ref[...])                         # scalar dot over D
    lane = jax.lax.broadcasted_iota(jnp.int32, o_ref.shape, 1)
    o_ref[...] = jnp.where(lane == b, s, o_ref[...])             # lane-dense scatter


def lightgcn_score(all_users, all_items, users, items):
    """all_users: (U, D), all_items: (I, D), users/items: (B,) -> gamma (B,)."""
    b = int(users.shape[0])
    d = all_users.shape[1]
    b_pad = _round_up(b, 128)    # lane-dense output slab

    out = pl.pallas_call(
        _score_kernel,
        out_shape=jax.ShapeDtypeStruct((1, b_pad), jnp.float32),
        grid_spec=pltpu.PrefetchScalarGridSpec(
            num_scalar_prefetch=2,
            grid=(b,),
            in_specs=[
                pl.BlockSpec((pl.Element(1), d), lambda bb, u, it: (u[bb], 0)),
                pl.BlockSpec((pl.Element(1), d), lambda bb, u, it: (it[bb], 0)),
            ],
            out_specs=pl.BlockSpec((1, b_pad), lambda bb, u, it: (0, 0)),
        ),
        compiler_params=pltpu.CompilerParams(
            dimension_semantics=("arbitrary",),
        ),
    )(users.astype(jnp.int32), items.astype(jnp.int32), all_users, all_items)
    return out[0, :b]


# ----------------------------------------------------------------------------
# Forward (mirror of LightGCN.forward(users, items))
# ----------------------------------------------------------------------------
def lightgcn_forward(graph, user_emb, item_emb, users, items, n_layers):
    num_users = user_emb.shape[0]
    all_emb = jnp.concatenate([user_emb, item_emb], axis=0)       # t.cat
    lgn_out = lightgcn_propagate(graph, all_emb, n_layers)        # compute()
    all_users = lgn_out[:num_users]
    all_items = lgn_out[num_users:]
    return lightgcn_score(all_users, all_items, users, items)     # sum(u*i, dim=1)


def _build_normalized_graph(key, num_users, num_items):
    """Synthetic dense D^-1/2 [[0,R],[R^T,0]] D^-1/2 like getSparseGraph()."""
    r = (jax.random.uniform(key, (num_users, num_items)) < 0.15).astype(jnp.float32)
    n = num_users + num_items
    a = jnp.zeros((n, n), jnp.float32)
    a = a.at[:num_users, num_users:].set(r)
    a = a.at[num_users:, :num_users].set(r.T)
    deg = jnp.sum(a, axis=1)
    d_inv_sqrt = jnp.where(deg > 0, 1.0 / jnp.sqrt(jnp.maximum(deg, 1e-12)), 0.0)
    return a * d_inv_sqrt[:, None] * d_inv_sqrt[None, :]


if __name__ == "__main__":
    # Small config consistent with LightGCN.__init_weight (sized to exercise tiling)
    num_users = 256
    num_items = 256
    latent_dim = 128      # config['latent_dim_rec']  (lane-width multiple)
    n_layers = 3          # config['lgn_layers']
    batch = 8

    key = jax.random.PRNGKey(0)
    k_g, k_u, k_i, k_bu, k_bi = jax.random.split(key, 5)

    # nn.init.normal_(std=0.1) on both embedding tables
    user_emb = 0.1 * jax.random.normal(k_u, (num_users, latent_dim), jnp.float32)
    item_emb = 0.1 * jax.random.normal(k_i, (num_items, latent_dim), jnp.float32)
    graph = _build_normalized_graph(k_g, num_users, num_items)

    users = jax.random.randint(k_bu, (batch,), 0, num_users)
    items = jax.random.randint(k_bi, (batch,), 0, num_items)

    gamma = lightgcn_forward(graph, user_emb, item_emb, users, items, n_layers)
    gamma = jax.block_until_ready(gamma)

    # Pure-JAX f32 reference of the same semantics. The kernel streams G (and
    # the MXU operands) in bf16 with f32 accumulation, so tolerance is loosened
    # relative to a pure f32 check.
    all_emb = jnp.concatenate([user_emb, item_emb], axis=0)
    embs = [all_emb]
    cur = all_emb
    for _ in range(n_layers):
        cur = graph @ cur
        embs.append(cur)
    lgn_out = jnp.mean(jnp.stack(embs, axis=1), axis=1)
    ref = jnp.sum(lgn_out[:num_users][users] * lgn_out[num_users:][items], axis=1)

    assert gamma.shape == (batch,)
    assert jnp.allclose(gamma, ref, atol=2e-3, rtol=2e-2), (
        f"max abs err {jnp.max(jnp.abs(gamma - ref))}")

    print("KERNEL_OK")
</pallas_src>

<mosaic_0001>
module attributes {stable_mosaic.version = 11 : i64} {
  func.func @_lgcn_prop_kernel(%arg0: i32, %arg1: i32, %arg2: i32, %arg3: i32, %arg4: memref<256x256xbf16, #tpu.memory_space<vmem>>, %arg5: memref<512x128xf32, #tpu.memory_space<vmem>>, %arg6: memref<256x128xf32, #tpu.memory_space<vmem>>, %arg7: memref<1024x128xf32, #tpu.memory_space<vmem>>, %arg8: memref<512x128xf32, #tpu.memory_space<vmem>>) attributes {dimension_semantics = [#tpu.dimension_semantics<parallel>, #tpu.dimension_semantics<arbitrary>, #tpu.dimension_semantics<arbitrary>, #tpu.dimension_semantics<arbitrary>], iteration_bounds = array<i64: 1, 3, 2, 2>, scalar_prefetch = 0 : i64, scratch_operands = 2 : i64, tpu.core_type = #tpu.core_type<tc>, window_params = [{transform_indices = @transform_0, window_bounds = array<i64: 256, 256>}, {transform_indices = @transform_1, window_bounds = array<i64: 512, 128>}, {transform_indices = @transform_2, window_bounds = array<i64: 256, 128>}]} {
    %c0_i32 = arith.constant 0 : i32
    %0 = arith.cmpi eq, %arg1, %c0_i32 : i32
    %c0_i32_0 = arith.constant 0 : i32
    %1 = arith.cmpi eq, %arg2, %c0_i32_0 : i32
    %c0_i32_1 = arith.constant 0 : i32
    %2 = arith.cmpi eq, %arg3, %c0_i32_1 : i32
    %3 = arith.andi %1, %2 : i1
    %4 = arith.andi %0, %3 : i1
    %5 = arith.extui %4 : i1 to i32
    %c0_i32_2 = arith.constant 0 : i32
    %6 = arith.cmpi ne, %5, %c0_i32_2 : i32
    scf.if %6 {
      %c0_24 = arith.constant 0 : index
      %c0_25 = arith.constant 0 : index
      %50 = vector.load %arg5[%c0_24, %c0_25] : memref<512x128xf32, #tpu.memory_space<vmem>>, vector<512x128xf32>
      %c0_26 = arith.constant 0 : index
      %c0_27 = arith.constant 0 : index
      %51 = vector.load %arg7[%c0_26, %c0_27] : memref<1024x128xf32, #tpu.memory_space<vmem>>, vector<512x128xf32>
      tpu.vector_store %arg7[%c0_26, %c0_27], %50 {strides = array<i32>} : memref<1024x128xf32, #tpu.memory_space<vmem>>, vector<512x128xf32>,
      %c0_28 = arith.constant 0 : index
      %c0_29 = arith.constant 0 : index
      %52 = vector.load %arg8[%c0_28, %c0_29] : memref<512x128xf32, #tpu.memory_space<vmem>>, vector<512x128xf32>
      tpu.vector_store %arg8[%c0_28, %c0_29], %50 {strides = array<i32>} : memref<512x128xf32, #tpu.memory_space<vmem>>, vector<512x128xf32>,
    } else {
    }
    %c2_i32 = arith.constant 2 : i32
    %c0_i32_3 = arith.constant 0 : i32
    %7 = arith.cmpi eq, %c2_i32, %c0_i32_3 : i32
    %c1_i32 = arith.constant 1 : i32
    %8 = arith.select %7, %c1_i32, %c2_i32 : i32
    %9 = arith.remsi %arg1, %8 : i32
    %c0_i32_4 = arith.constant 0 : i32
    %10 = arith.cmpi ne, %9, %c0_i32_4 : i32
    %c0_i32_5 = arith.constant 0 : i32
    %11 = arith.cmpi slt, %9, %c0_i32_5 : i32
    %c0_i32_6 = arith.constant 0 : i32
    %12 = arith.cmpi slt, %8, %c0_i32_6 : i32
    %13 = arith.xori %11, %12 : i1
    %14 = arith.andi %13, %10 : i1
    %15 = arith.addi %9, %8 : i32
    %16 = arith.select %14, %15, %9 : i32
    %c1_i32_7 = arith.constant 1 : i32
    %17 = arith.addi %arg1, %c1_i32_7 : i32
    %c2_i32_8 = arith.constant 2 : i32
    %c0_i32_9 = arith.constant 0 : i32
    %18 = arith.cmpi eq, %c2_i32_8, %c0_i32_9 : i32
    %c1_i32_10 = arith.constant 1 : i32
    %19 = arith.select %18, %c1_i32_10, %c2_i32_8 : i32
    %20 = arith.remsi %17, %19 : i32
    %c0_i32_11 = arith.constant 0 : i32
    %21 = arith.cmpi ne, %20, %c0_i32_11 : i32
    %c0_i32_12 = arith.constant 0 : i32
    %22 = arith.cmpi slt, %20, %c0_i32_12 : i32
    %c0_i32_13 = arith.constant 0 : i32
    %23 = arith.cmpi slt, %19, %c0_i32_13 : i32
    %24 = arith.xori %22, %23 : i1
    %25 = arith.andi %24, %21 : i1
    %26 = arith.addi %20, %19 : i32
    %27 = arith.select %25, %26, %20 : i32
    %c512_i32 = arith.constant 512 : i32
    %28 = arith.muli %16, %c512_i32 : i32
    %c256_i32 = arith.constant 256 : i32
    %29 = arith.muli %arg3, %c256_i32 : i32
    %30 = arith.addi %28, %29 : i32
    %31 = tpu.assume_multiple %30, 256 : i32
    %c512_i32_14 = arith.constant 512 : i32
    %32 = arith.muli %27, %c512_i32_14 : i32
    %c256_i32_15 = arith.constant 256 : i32
    %33 = arith.muli %arg2, %c256_i32_15 : i32
    %34 = arith.addi %32, %33 : i32
    %35 = tpu.assume_multiple %34, 256 : i32
    %c0 = arith.constant 0 : index
    %c0_16 = arith.constant 0 : index
    %36 = vector.load %arg4[%c0, %c0_16] : memref<256x256xbf16, #tpu.memory_space<vmem>>, vector<256x256xbf16>
    %37 = arith.index_cast %31 : i32 to index
    %c0_17 = arith.constant 0 : index
    %38 = vector.load %arg7[%37, %c0_17] : memref<1024x128xf32, #tpu.memory_space<vmem>>, vector<256x128xf32>
    %39 = arith.truncf %38 : vector<256x128xf32> to vector<256x128xbf16>
    %cst = arith.constant dense<0.000000e+00> : vector<256x128xf32>
    %40 = tpu.matmul %36, %39, %cst {dimension_numbers = #tpu.dot_dimension_numbers<[1], [0], [0], [1], [0, 0, 1, 1], [], []>} : vector<256x256xbf16>, vector<256x128xbf16>, vector<256x128xf32> -> vector<256x128xf32>
    %c0_i32_18 = arith.constant 0 : i32
    %41 = arith.cmpi eq, %arg3, %c0_i32_18 : i32
    %42 = arith.extui %41 : i1 to i32
    %c0_i32_19 = arith.constant 0 : i32
    %43 = arith.cmpi ne, %42, %c0_i32_19 : i32
    scf.if %43 {
      %50 = arith.index_cast %35 : i32 to index
      %c0_24 = arith.constant 0 : index
      %51 = vector.load %arg7[%50, %c0_24] : memref<1024x128xf32, #tpu.memory_space<vmem>>, vector<256x128xf32>
      tpu.vector_store %arg7[%50, %c0_24], %40 {strides = array<i32>} : memref<1024x128xf32, #tpu.memory_space<vmem>>, vector<256x128xf32>,
    } else {
    }
    %c0_i32_20 = arith.constant 0 : i32
    %44 = arith.cmpi ne, %arg3, %c0_i32_20 : i32
    %45 = arith.extui %44 : i1 to i32
    %c0_i32_21 = arith.constant 0 : i32
    %46 = arith.cmpi ne, %45, %c0_i32_21 : i32
    scf.if %46 {
      %50 = arith.index_cast %35 : i32 to index
      %c0_24 = arith.constant 0 : index
      %51 = vector.load %arg7[%50, %c0_24] : memref<1024x128xf32, #tpu.memory_space<vmem>>, vector<256x128xf32>
      %52 = arith.addf %51, %40 : vector<256x128xf32>
      %53 = arith.index_cast %35 : i32 to index
      %c0_25 = arith.constant 0 : index
      %54 = vector.load %arg7[%53, %c0_25] : memref<1024x128xf32, #tpu.memory_space<vmem>>, vector<256x128xf32>
      tpu.vector_store %arg7[%53, %c0_25], %52 {strides = array<i32>} : memref<1024x128xf32, #tpu.memory_space<vmem>>, vector<256x128xf32>,
    } else {
    }
    %c1_i32_22 = arith.constant 1 : i32
    %47 = arith.cmpi eq, %arg3, %c1_i32_22 : i32
    %48 = arith.extui %47 : i1 to i32
    %c0_i32_23 = arith.constant 0 : i32
    %49 = arith.cmpi ne, %48, %c0_i32_23 : i32
    scf.if %49 {
      %c256_i32_24 = arith.constant 256 : i32
      %50 = arith.muli %arg2, %c256_i32_24 : i32
      %51 = tpu.assume_multiple %50, 256 : i32
      %52 = arith.index_cast %51 : i32 to index
      %c0_25 = arith.constant 0 : index
      %53 = vector.load %arg8[%52, %c0_25] : memref<512x128xf32, #tpu.memory_space<vmem>>, vector<256x128xf32>
      %54 = arith.index_cast %35 : i32 to index
      %c0_26 = arith.constant 0 : index
      %55 = vector.load %arg7[%54, %c0_26] : memref<1024x128xf32, #tpu.memory_space<vmem>>, vector<256x128xf32>
      %56 = arith.addf %53, %55 : vector<256x128xf32>
      %57 = arith.index_cast %51 : i32 to index
      %c0_27 = arith.constant 0 : index
      %58 = vector.load %arg8[%57, %c0_27] : memref<512x128xf32, #tpu.memory_space<vmem>>, vector<256x128xf32>
      tpu.vector_store %arg8[%57, %c0_27], %56 {strides = array<i32>} : memref<512x128xf32, #tpu.memory_space<vmem>>, vector<256x128xf32>,
      %59 = arith.index_cast %51 : i32 to index
      %c0_28 = arith.constant 0 : index
      %60 = vector.load %arg8[%59, %c0_28] : memref<512x128xf32, #tpu.memory_space<vmem>>, vector<256x128xf32>
      %cst_29 = arith.constant 2.500000e-01 : f32
      %61 = vector.broadcast %cst_29 : f32 to vector<256x128xf32>
      %62 = arith.mulf %60, %61 : vector<256x128xf32>
      %c0_30 = arith.constant 0 : index
      %c0_31 = arith.constant 0 : index
      %63 = vector.load %arg6[%c0_30, %c0_31] : memref<256x128xf32, #tpu.memory_space<vmem>>, vector<256x128xf32>
      tpu.vector_store %arg6[%c0_30, %c0_31], %62 {strides = array<i32>} : memref<256x128xf32, #tpu.memory_space<vmem>>, vector<256x128xf32>,
    } else {
    }
    return
  }
  func.func @transform_0(%arg0: i32, %arg1: i32, %arg2: i32, %arg3: i32) -> (i32, i32) {
    %c0_i32 = arith.constant 0 : i32
    return %arg2, %arg3 : i32, i32
  }
  func.func @transform_1(%arg0: i32, %arg1: i32, %arg2: i32, %arg3: i32) -> (i32, i32) {
    %c0_i32 = arith.constant 0 : i32
    %c0_i32_0 = arith.constant 0 : i32
    return %c0_i32, %arg0 : i32, i32
  }
  func.func @transform_2(%arg0: i32, %arg1: i32, %arg2: i32, %arg3: i32) -> (i32, i32) {
    %c0_i32 = arith.constant 0 : i32
    return %arg2, %arg0 : i32, i32
  }
}

</mosaic_0001>

<bundles_post_ra>
// kernel: tpu_custom_call.1
= control target key start
LH: loop header
LB: loop body
LE: loop exit
PB: predicated region body
PF: predicated region fallthrough
CT: control target
= control target key end

     0   :  { %s2720_s0 = inlined_call_operand.hbm [shape: bf16[512,512], index: 0, kind: input, shape index: {}]   ;;  %s2721_s1 = inlined_call_operand.hbm [shape: f32[512,128], index: 1, kind: input, shape index: {}]   ;;  %s2722_s2 = inlined_call_operand.hbm [shape: f32[512,128], index: 2, kind: output, shape index: {}]  }
   0x1   :  { %2742 = sst [smem:[#allocation21_spill]] %s2721_s1 }
   0x2   :  { %2743 = sst [smem:[#allocation22_spill]] %s2722_s2 }
   0x3   :  { %7 = vsyncpa [#allocation5], 0 }
   0x4   :  { %9 = vsyncpa [#allocation5 + $0x1], 0 }
   0x5   :  { %10 = vsyncpa [#allocation8], 0 }
   0x6   :  { %11 = vsyncpa [#allocation6], 0 }
   0x7   :  { %13 = vsyncpa [#allocation6 + $0x1], 0  ;;  %s1966_s9 = smov 0   ;;  %s1968_s10 = smov 0  }
   0x8   :  { %s1970_s11 = smov 0   ;;  %s1972_s12 = smov 0  }
   0x9   :  { %s1974_s13 = smov 0   ;;  %s1976_s14 = smov 0  }
   0xa   :  { %s1978_s15 = smov 0   ;;  %s1980_s16 = smov 0  }
   0xb   :  { %s1982_s17 = smov 0   ;;  %s1984_s18 = smov 0  }
   0xc   :  { %s1986_s19 = smov 0   ;;  %s1988_s20 = smov 0  }
   0xd   :  { %s1990_s21 = smov 0  }
   0xe LB: > { %2744 = sst [smem:[#allocation13_spill]] %s1893_s9  ;;  %s1365_s22 = sadd.s32 4294967295, %s1941_s21   ;;  %s1941_s21 = sphi %s1990_s21, %s19_s21   ;;  %s1937_s20 = sphi %s1988_s20, %s2792_s20   ;;  %s1933_s19 = sphi %s1986_s19, %s2791_s19   ;;  %s1929_s18 = sphi %s1984_s18, %s2790_s18   ;;  %s1925_s17 = sphi %s1982_s17, %s2789_s17   ;;  %s1921_s16 = sphi %s1980_s16, %s2788_s16   ;;  %s1917_s15 = sphi %s1978_s15, %s2777_s15   ;;  %s1913_s14 = sphi %s1976_s14, %s2787_s14   ;;  %s1909_s13 = sphi %s1974_s13, %s2786_s13   ;;  %s1905_s12 = sphi %s1972_s12, %s2785_s12   ;;  %s1901_s11 = sphi %s1970_s11, %s2784_s11   ;;  %s1897_s10 = sphi %s1968_s10, %s2783_s10   ;;  %s1893_s9 = sphi %s1966_s9, %s2782_s9  }
   0xf   : > { %2745 = sst [smem:[#allocation14_spill]] %s1929_s18  ;;  %s1366_s23 = sadd.s32 4294967294, %s1941_s21  }
  0x10   : > { %2746 = sst [smem:[#allocation15_spill]] %s1937_s20  ;;  %p61_p0 = scmp.ne.s32.totalorder %s1913_s14, %s1909_s13 }
  0x11   : > { %2747 = sst [smem:[#allocation16_spill]] %s1941_s21  ;;  %p62_p1 = scmp.eq.s32.totalorder %s1941_s21, 0 }
  0x12   : > { %p67_p2 = scmp.ne.s32.totalorder %s1909_s13, %s1905_s12  ;;  %p2036_p3 = scmp.eq.s32.totalorder %s1365_s22, 0 }
  0x13   : > { %p2041_p4 = por %p62_p1, %p61_p0  ;;  %p118_p5 = scmp.ne.s32.totalorder %s1901_s11, %s1897_s10 }
  0x14   : > { %s2748_s25 = scalar_select %p2036_p3, 1, 0 }
  0x15   : > { %p2049_p6 = por %p2036_p3, %p67_p2  ;;  %p119_p7 = scmp.eq.s32.totalorder %s1365_s22, 11 }
  0x16   : > { %p124_p8 = scmp.ne.s32.totalorder %s1897_s10, %s1893_s9  ;;  %p125_p9 = scmp.eq.s32.totalorder %s1366_s23, 11 }
  0x17   : > { %s2750_s28 = scalar_select %p2049_p6, 1, 0 }
  0x18   : > { %p2055_p10 = por %p119_p7, %p118_p5  ;;  %p1367_p11 = scmp.ge.s32.totalorder %s1941_s21, 1 }
  0x19   : > { %p2060_p12 = por %p125_p9, %p124_p8  ;;  %p132_p13 = scmp.lt.s32.totalorder %s1941_s21, 13 }
  0x1a   : > { %s2751_s29 = scalar_select %p2055_p10, 1, 0 }
  0x1b   : > { %s2753_s30 = scalar_select %p2060_p12, 1, 0 }
  0x1c   : > { %2752 = sst [smem:[#allocation17_spill]] %s2751_s29  ;;  %p2065_p0 = pnand %p1367_p11, %p132_p13 }
  0x1d   : > { %2754 = sst [smem:[#allocation18_spill]] %s2753_s30  ;;  %s1943_s4 = smov [#allocation7]  }
  0x1e   : > { %s2755_s3 = scalar_select %p2065_p0, 1, 0 }
  0x1f   : > { %s146_s5 = sshll.u32 %s1943_s4, 4  ;;  %p1567_p1 = pneg %p2065_p0  ;;  %s147_s5 = int_to_ptr.vmem [resolvable:$true] %s146_s5 }
  0x20   : > { %p1580_p2 = scmp.lt.s32.totalorder %s1941_s21, 12  ;;  %s2758_s1 = sld [smem:[#allocation21_spill]] }
  0x21   : > { %p2074_p5 = pnand %p1567_p1, %p2036_p3 }
  0x22   : > { %p2080_p7 = pnand %p1580_p2, %p2041_p4 }
  0x23   : > { %p1743_p9 = pneg %p2074_p5 }
  0x24   : > { %s2757_s7 = scalar_select %p2080_p7, 1, 0 }
  0x26   : > { %s1741_s22 = scalar_lea.hbm %s2758_s1, 8192 }
  0x27   : > { %p1742_p8 = scmp.ne.s32.totalorder %s2758_s1, %s1741_s22  ;;  %p1748_p1 = scmp.lt.u32.totalorder %s1741_s22, %s2758_s1 }
  0x29   : > { %p1744_p11 = pnand %p1743_p9, %p1742_p8 }
  0x2b   : > { %p1745_p13 = pneg %p1744_p11 }
  0x2d   : > { %p1750_p4 = pnand %p1748_p1, %p1745_p13 }
  0x2f   : > { %1753 = shalt.err (!%p1750_p4)
}
  0x30   : > { %s1754_s27 = scalar_lea.vmem %s147_s5, 8192  ;;  %p1762_p3 = scmp.lt.s32.totalorder %s147_s5, %s147_s5 }
  0x31   : > { %p1755_p2 = scmp.ne.s32.totalorder %s147_s5, %s1754_s27  ;;  %p1763_p6 = scmp.lt.s32.totalorder %s1754_s27, %s1754_s27 }
  0x33   : > { %p1757_p12 = pnand %p1755_p2, %p1743_p9  ;;  %p1764_p0 = por %p1763_p6, %p1762_p3 }
  0x35   : > { %p1758_p10 = pneg %p1757_p12 }
  0x37   : > { %p1765_p7 = pnand %p1764_p0, %p1758_p10 }
  0x39   : > { %1768 = shalt.err (!%p1765_p7)
}
  0x3a   : > { %s2731_s8 = smov 128   ;;  %s2732_s24 = smov 8  }
  0x3b   : > { %1570 = dma.hbm_to_vmem [thread:$0]  (!%p2074_p5), %s2758_s1, 8192, %s147_s5, [#allocation8], %s2731_s8, %s2731_s8, %s2732_s24  }
  0x3c   : > { %s34_s22 = sadd.s32 1, %s1929_s18  ;;  %s37_s23 = sadd.s32 1, %s1933_s19 }
  0x3d   : > { %p35_p3 = scmp.ge.s32.totalorder %s34_s22, 2  ;;  %s41_s4 = sadd.s32 1, %s1937_s20 }
  0x3e   : > { %s160_s27 = sand.u32 1, %s1913_s14   ;;  %s1372_s30 = sshll.u32 %s1929_s18, 1 }
  0x3f   : > { %s2794_s22 = smov (%p35_p3, %s34_s22), 0  ;;  %s2796_s23 = smov (!%p35_p3, %s37_s23), %s1933_s19 }
  0x40   : > { %2759 = sst [smem:[#allocation19_spill]] %s2794_s22  ;;  %s50_s6 = ssub.s32 %s1929_s18, %s2794_s22 }
  0x41   : > { %p39_p6 = scmp.ge.s32.totalorder %s2796_s23, 2  ;;  %s1370_s9 = sshll.u32 %s160_s27, 8 }
  0x42   : > { %s1429_s26 = sshll.u32 %s1933_s19, 7  ;;  %s2761_s24 = sadd.s32 1, %s1913_s14 }
  0x43   : > { %s2798_s23 = smov (%p39_p6, %s2796_s23), 0  ;;  %s2800_s4 = smov (!%p39_p6, %s41_s4), %s1937_s20 }
  0x44   : > { %2760 = sst [smem:[#allocation20_spill]] %s2798_s23  ;;  %s49_s5 = ssub.s32 %s1933_s19, %s2798_s23 }
  0x45   : > { %s171_s12 = sadd.s32 %s1429_s26, %s1372_s30  ;;  %p43_p10 = scmp.ge.s32.totalorder %s2800_s4, 3 }
  0x46   : > { %s51_s8 = sor.u32 %s50_s6, %s49_s5  ;;  %p106_p0 = scmp.eq.s32.totalorder %s49_s5, 0 }
  0x47   : > { %p52_p12 = scmp.eq.s32.totalorder %s51_s8, 0  ;;  %s2802_s4 = smov (%p43_p10, %s2800_s4), 0 }
  0x48   : > { %s2762_s22 = sadd.s32 1, %s1901_s11  ;;  %s1374_s21 = sshll.u32 %s171_s12, 6 }
  0x49   : > { %s2124_s1 = scalar_select %p52_p12, %s1913_s14, %s2761_s24  }
  0x4a   : > { %s2129_s18 = scalar_select %p106_p0, %s1901_s11, %s2762_s22  }
  0x4b   : > { %s164_s2 = scalar_lea.vmem [#allocation4], %s1370_s9  ;;  %s2134_s30 = scalar_lea.hbm %s2720_s0, %s1374_s21 }
  0x4c   : > { %s174_s29 = sshll.u32 %s164_s2, 4  ;;  %s2138_s8 = scalar_lea.sflag [#allocation5], %s160_s27  ;;  %s2136_s29 = int_to_ptr.vmem [resolvable:$true] %s174_s29 }
  0x4d   : > { %s1769_s24 = scalar_lea.hbm %s2134_s30, 4096  ;;  %p2763_p7 = scmp.ne.s32.totalorder %s2757_s7, 0 }
  0x4e   : > { %p1770_p5 = scmp.ne.s32.totalorder %s2134_s30, %s1769_s24  ;;  %s1774_s20 = scalar_lea.hbm %s2720_s0, 16384 }
  0x4f   : > { %p1771_p8 = pneg %p2763_p7  ;;  %p1775_p13 = scmp.lt.u32.totalorder %s2134_s30, %s2720_s0 }
  0x50   : > { %p1776_p1 = scmp.lt.u32.totalorder %s1774_s20, %s1769_s24  ;;  %p1778_p2 = scmp.lt.u32.totalorder %s1769_s24, %s2134_s30 }
  0x51   : > { %p1772_p9 = pnand %p1771_p8, %p1770_p5 }
  0x52   : > { %p1777_p4 = por %p1776_p1, %p1775_p13 }
  0x53   : > { %p1773_p11 = pneg %p1772_p9 }
  0x54   : > { %p1779_p3 = por %p1778_p2, %p1777_p4 }
  0x56   : > { %p1780_p6 = pnand %p1779_p3, %p1773_p11 }
  0x58   : > { %1783 = shalt.err (!%p1780_p6)
}
  0x59   : > { %s1784_s23 = scalar_lea.vmem %s2136_s29, 4096  ;;  %s1946_s27 = smov [#allocation4]  }
  0x5a   : > { %p1785_p10 = scmp.ne.s32.totalorder %s2136_s29, %s1784_s23  ;;  %s1789_s6 = sshll.u32 %s1946_s27, 4  ;;  %s1790_s6 = int_to_ptr.vmem [resolvable:$false] %s1789_s6 }
  0x5b   : > { %s1791_s26 = scalar_lea.vmem %s1790_s6, 8192  ;;  %p1792_p5 = scmp.lt.s32.totalorder %s2136_s29, %s1790_s6 }
  0x5c   : > { %p1787_p12 = pnand %p1785_p10, %p1771_p8  ;;  %p1793_p9 = scmp.lt.s32.totalorder %s1791_s26, %s1784_s23 }
  0x5e   : > { %p1788_p0 = pneg %p1787_p12  ;;  %p1794_p13 = por %p1793_p9, %p1792_p5 }
  0x60   : > { %p1795_p1 = pnand %p1794_p13, %p1788_p0 }
  0x62   : > { %1798 = shalt.err (!%p1795_p1)
}
  0x63   : > { %s1947_s5 = smov 256   ;;  %s2764_s12 = smov 8  }
  0x64   : > { %s2765_s24 = smov 128   ;;  %p2766_p8 = scmp.ne.s32.totalorder %s2755_s3, 0 }
  0x65   : > { %1574 = dma.hbm_to_vmem [thread:$0]  (!%p2763_p7), %s2134_s30, 4096, %s2136_s29, %s2138_s8, %s1947_s5, %s2765_s24, %s2764_s12  }
  0x66   : > { %186 = sbr.rel (%p2766_p8) target bundleno = 601 (0x259), region = 28  ;;  %s188_s2 = sand.u32 (!%p2766_p8), 1, %s1909_s13  }
  0x67   : > { %s1376_s9 = sshll.u32 (!%p2766_p8), %s188_s2, 8  ;;  %s189_s20 = scalar_lea.sflag (!%p2766_p8), [#allocation5], %s188_s2 }
  0x68   : > { %s2171_s21 = scalar_lea.vmem (!%p2766_p8), [#allocation4], %s1376_s9  ;;  %p2767_p11 = scmp.ne.s32.totalorder (!%p2766_p8), %s2750_s28, 0 }
  0x6d   : > { %1880 = dma.done.wait (%p2767_p11), %s189_s20, 4096  }
  0x6e   : > { %1882 = vsyncadd (%p2767_p11), %s189_s20, 4294963200  ;;  %p2768_p4 = scmp.ne.s32.totalorder %s2748_s25, 0 }
  0x70   : > { %1884 = dma.done.wait (%p2768_p4), [#allocation8], 8192  }
  0x71   : > { %1886 = vsyncadd (%p2768_p4), [#allocation8], 4294959104  ;;  %s214_s29 = sand.u32 1, %s1897_s10   ;;  %p222_p7 = scmp.eq.s32.totalorder %s1921_s16, 0 }
  0x72   : > { %s1378_s3 = sshll.u32 %s214_s29, 8  ;;  %p223_p2 = scmp.eq.s32.totalorder %s1917_s15, 0 }
  0x73   : > { %p221_p3 = scmp.eq.s32.totalorder %s1925_s17, 0  ;;  %s2189_s28 = scalar_lea.vmem [#allocation9], %s1378_s3 }
  0x74   : > { %p224_p6 = pnand %p223_p2, %p222_p7 }
  0x76   : > { %p225_p10 = pneg %p224_p6 }
  0x78   : > { %p226_p12 = pnand %p225_p10, %p221_p3 }
  0x79   : > { %v230_v0 = vld [vmem:[#allocation7] sm:$0xff] (!%p226_p12)  ;;  %v231_v1 = vld [vmem:[#allocation7 + $0x8] sm:$0xff] (!%p226_p12)  ;;  %v232_v2 = vld [vmem:[#allocation7 + $0x10] sm:$0xff] (!%p226_p12) }
  0x7a   : > { %229 = sbr.rel (%p226_p12) target bundleno = 186 (0xba), region = 40  ;;  %294 = vst [vmem:[#allocation2] sm:$0xff] (!%p226_p12), %v230_v0  ;;  %358 = vst [vmem:[#allocation3] sm:$0xff] (!%p226_p12), %v230_v0  ;;  %v233_v3 = vld [vmem:[#allocation7 + $0x18] sm:$0xff] (!%p226_p12)  ;;  %v234_v4 = vld [vmem:[#allocation7 + $0x20] sm:$0xff] (!%p226_p12) }
  0x7b   : > { %295 = vst [vmem:[#allocation2 + $0x8] sm:$0xff] (!%p226_p12), %v231_v1  ;;  %359 = vst [vmem:[#allocation3 + $0x8] sm:$0xff] (!%p226_p12), %v231_v1  ;;  %v235_v5 = vld [vmem:[#allocation7 + $0x28] sm:$0xff] (!%p226_p12)  ;;  %v236_v6 = vld [vmem:[#allocation7 + $0x30] sm:$0xff] (!%p226_p12) }
  0x7c   : > { %296 = vst [vmem:[#allocation2 + $0x10] sm:$0xff] (!%p226_p12), %v232_v2  ;;  %360 = vst [vmem:[#allocation3 + $0x10] sm:$0xff] (!%p226_p12), %v232_v2  ;;  %v237_v7 = vld [vmem:[#allocation7 + $0x38] sm:$0xff] (!%p226_p12)  ;;  %v238_v8 = vld [vmem:[#allocation7 + $0x40] sm:$0xff] (!%p226_p12) }
  0x7d   : > { %297 = vst [vmem:[#allocation2 + $0x18] sm:$0xff] (!%p226_p12), %v233_v3  ;;  %361 = vst [vmem:[#allocation3 + $0x18] sm:$0xff] (!%p226_p12), %v233_v3  ;;  %v239_v9 = vld [vmem:[#allocation7 + $0x48] sm:$0xff] (!%p226_p12)  ;;  %v240_v10 = vld [vmem:[#allocation7 + $0x50] sm:$0xff] (!%p226_p12) }
  0x7e   : > { %298 = vst [vmem:[#allocation2 + $0x20] sm:$0xff] (!%p226_p12), %v234_v4  ;;  %362 = vst [vmem:[#allocation3 + $0x20] sm:$0xff] (!%p226_p12), %v234_v4  ;;  %v241_v11 = vld [vmem:[#allocation7 + $0x58] sm:$0xff] (!%p226_p12)  ;;  %v242_v12 = vld [vmem:[#allocation7 + $0x60] sm:$0xff] (!%p226_p12) }
  0x7f   : > { %299 = vst [vmem:[#allocation2 + $0x28] sm:$0xff] (!%p226_p12), %v235_v5  ;;  %363 = vst [vmem:[#allocation3 + $0x28] sm:$0xff] (!%p226_p12), %v235_v5  ;;  %v243_v13 = vld [vmem:[#allocation7 + $0x68] sm:$0xff] (!%p226_p12)  ;;  %v244_v14 = vld [vmem:[#allocation7 + $0x70] sm:$0xff] (!%p226_p12) }
  0x80   : > { %300 = vst [vmem:[#allocation2 + $0x30] sm:$0xff] (!%p226_p12), %v236_v6  ;;  %364 = vst [vmem:[#allocation3 + $0x30] sm:$0xff] (!%p226_p12), %v236_v6  ;;  %v245_v15 = vld [vmem:[#allocation7 + $0x78] sm:$0xff] (!%p226_p12)  ;;  %v246_v16 = vld [vmem:[#allocation7 + $0x80] sm:$0xff] (!%p226_p12) }
  0x81   : > { %301 = vst [vmem:[#allocation2 + $0x38] sm:$0xff] %v237_v7  ;;  %365 = vst [vmem:[#allocation3 + $0x38] sm:$0xff] %v237_v7  ;;  %v247_v17 = vld [vmem:[#allocation7 + $0x88] sm:$0xff]  ;;  %v248_v18 = vld [vmem:[#allocation7 + $0x90] sm:$0xff] }
  0x82   : > { %302 = vst [vmem:[#allocation2 + $0x40] sm:$0xff] %v238_v8  ;;  %366 = vst [vmem:[#allocation3 + $0x40] sm:$0xff] %v238_v8  ;;  %v249_v19 = vld [vmem:[#allocation7 + $0x98] sm:$0xff]  ;;  %v250_v20 = vld [vmem:[#allocation7 + $0xa0] sm:$0xff] }
  0x83   : > { %303 = vst [vmem:[#allocation2 + $0x48] sm:$0xff] %v239_v9  ;;  %367 = vst [vmem:[#allocation3 + $0x48] sm:$0xff] %v239_v9  ;;  %v251_v21 = vld [vmem:[#allocation7 + $0xa8] sm:$0xff]  ;;  %v252_v22 = vld [vmem:[#allocation7 + $0xb0] sm:$0xff] }
  0x84   : > { %304 = vst [vmem:[#allocation2 + $0x50] sm:$0xff] %v240_v10  ;;  %368 = vst [vmem:[#allocation3 + $0x50] sm:$0xff] %v240_v10  ;;  %v253_v23 = vld [vmem:[#allocation7 + $0xb8] sm:$0xff]  ;;  %v254_v24 = vld [vmem:[#allocation7 + $0xc0] sm:$0xff] }
  0x85   : > { %305 = vst [vmem:[#allocation2 + $0x58] sm:$0xff] %v241_v11  ;;  %369 = vst [vmem:[#allocation3 + $0x58] sm:$0xff] %v241_v11  ;;  %v255_v25 = vld [vmem:[#allocation7 + $0xc8] sm:$0xff]  ;;  %v256_v26 = vld [vmem:[#allocation7 + $0xd0] sm:$0xff] }
  0x86   : > { %306 = vst [vmem:[#allocation2 + $0x60] sm:$0xff] %v242_v12  ;;  %370 = vst [vmem:[#allocation3 + $0x60] sm:$0xff] %v242_v12  ;;  %v257_v27 = vld [vmem:[#allocation7 + $0xd8] sm:$0xff]  ;;  %v258_v28 = vld [vmem:[#allocation7 + $0xe0] sm:$0xff] }
  0x87   : > { %307 = vst [vmem:[#allocation2 + $0x68] sm:$0xff] %v243_v13  ;;  %371 = vst [vmem:[#allocation3 + $0x68] sm:$0xff] %v243_v13  ;;  %v259_v29 = vld [vmem:[#allocation7 + $0xe8] sm:$0xff]  ;;  %v260_v30 = vld [vmem:[#allocation7 + $0xf0] sm:$0xff] }
  0x88   : > { %308 = vst [vmem:[#allocation2 + $0x70] sm:$0xff] %v244_v14  ;;  %372 = vst [vmem:[#allocation3 + $0x70] sm:$0xff] %v244_v14  ;;  %v261_v31 = vld [vmem:[#allocation7 + $0xf8] sm:$0xff]  ;;  %v262_v32 = vld [vmem:[#allocation7 + $0x100] sm:$0xff] }
  0x89   : > { %309 = vst [vmem:[#allocation2 + $0x78] sm:$0xff] %v245_v15  ;;  %373 = vst [vmem:[#allocation3 + $0x78] sm:$0xff] %v245_v15  ;;  %v263_v33 = vld [vmem:[#allocation7 + $0x108] sm:$0xff]  ;;  %v264_v34 = vld [vmem:[#allocation7 + $0x110] sm:$0xff] }
  0x8a   : > { %310 = vst [vmem:[#allocation2 + $0x80] sm:$0xff] %v246_v16  ;;  %374 = vst [vmem:[#allocation3 + $0x80] sm:$0xff] %v246_v16  ;;  %v265_v35 = vld [vmem:[#allocation7 + $0x118] sm:$0xff]  ;;  %v266_v36 = vld [vmem:[#allocation7 + $0x120] sm:$0xff] }
  0x8b   : > { %311 = vst [vmem:[#allocation2 + $0x88] sm:$0xff] %v247_v17  ;;  %375 = vst [vmem:[#allocation3 + $0x88] sm:$0xff] %v247_v17  ;;  %v267_v37 = vld [vmem:[#allocation7 + $0x128] sm:$0xff]  ;;  %v268_v38 = vld [vmem:[#allocation7 + $0x130] sm:$0xff] }
  0x8c   : > { %312 = vst [vmem:[#allocation2 + $0x90] sm:$0xff] %v248_v18  ;;  %376 = vst [vmem:[#allocation3 + $0x90] sm:$0xff] %v248_v18  ;;  %v269_v39 = vld [vmem:[#allocation7 + $0x138] sm:$0xff]  ;;  %v270_v40 = vld [vmem:[#allocation7 + $0x140] sm:$0xff] }
  0x8d   : > { %313 = vst [vmem:[#allocation2 + $0x98] sm:$0xff] %v249_v19  ;;  %377 = vst [vmem:[#allocation3 + $0x98] sm:$0xff] %v249_v19  ;;  %v271_v41 = vld [vmem:[#allocation7 + $0x148] sm:$0xff]  ;;  %v272_v42 = vld [vmem:[#allocation7 + $0x150] sm:$0xff] }
  0x8e   : > { %314 = vst [vmem:[#allocation2 + $0xa0] sm:$0xff] %v250_v20  ;;  %378 = vst [vmem:[#allocation3 + $0xa0] sm:$0xff] %v250_v20  ;;  %v273_v43 = vld [vmem:[#allocation7 + $0x158] sm:$0xff]  ;;  %v274_v44 = vld [vmem:[#allocation7 + $0x160] sm:$0xff] }
  0x8f   : > { %315 = vst [vmem:[#allocation2 + $0xa8] sm:$0xff] %v251_v21  ;;  %379 = vst [vmem:[#allocation3 + $0xa8] sm:$0xff] %v251_v21  ;;  %v275_v45 = vld [vmem:[#allocation7 + $0x168] sm:$0xff]  ;;  %v276_v46 = vld [vmem:[#allocation7 + $0x170] sm:$0xff] }
  0x90   : > { %316 = vst [vmem:[#allocation2 + $0xb0] sm:$0xff] %v252_v22  ;;  %380 = vst [vmem:[#allocation3 + $0xb0] sm:$0xff] %v252_v22  ;;  %v277_v47 = vld [vmem:[#allocation7 + $0x178] sm:$0xff]  ;;  %v278_v48 = vld [vmem:[#allocation7 + $0x180] sm:$0xff] }
  0x91   : > { %317 = vst [vmem:[#allocation2 + $0xb8] sm:$0xff] %v253_v23  ;;  %381 = vst [vmem:[#allocation3 + $0xb8] sm:$0xff] %v253_v23  ;;  %v279_v49 = vld [vmem:[#allocation7 + $0x188] sm:$0xff]  ;;  %v280_v50 = vld [vmem:[#allocation7 + $0x190] sm:$0xff] }
  0x92   : > { %318 = vst [vmem:[#allocation2 + $0xc0] sm:$0xff] %v254_v24  ;;  %382 = vst [vmem:[#allocation3 + $0xc0] sm:$0xff] %v254_v24  ;;  %v281_v51 = vld [vmem:[#allocation7 + $0x198] sm:$0xff]  ;;  %v282_v52 = vld [vmem:[#allocation7 + $0x1a0] sm:$0xff] }
  0x93   : > { %319 = vst [vmem:[#allocation2 + $0xc8] sm:$0xff] %v255_v25  ;;  %383 = vst [vmem:[#allocation3 + $0xc8] sm:$0xff] %v255_v25  ;;  %v283_v53 = vld [vmem:[#allocation7 + $0x1a8] sm:$0xff]  ;;  %v284_v54 = vld [vmem:[#allocation7 + $0x1b0] sm:$0xff] }
  0x94   : > { %320 = vst [vmem:[#allocation2 + $0xd0] sm:$0xff] %v256_v26  ;;  %384 = vst [vmem:[#allocation3 + $0xd0] sm:$0xff] %v256_v26  ;;  %v285_v55 = vld [vmem:[#allocation7 + $0x1b8] sm:$0xff]  ;;  %v286_v56 = vld [vmem:[#allocation7 + $0x1c0] sm:$0xff] }
  0x95   : > { %321 = vst [vmem:[#allocation2 + $0xd8] sm:$0xff] %v257_v27  ;;  %385 = vst [vmem:[#allocation3 + $0xd8] sm:$0xff] %v257_v27  ;;  %v287_v57 = vld [vmem:[#allocation7 + $0x1c8] sm:$0xff]  ;;  %v288_v58 = vld [vmem:[#allocation7 + $0x1d0] sm:$0xff] }
  0x96   : > { %322 = vst [vmem:[#allocation2 + $0xe0] sm:$0xff] %v258_v28  ;;  %386 = vst [vmem:[#allocation3 + $0xe0] sm:$0xff] %v258_v28  ;;  %v289_v59 = vld [vmem:[#allocation7 + $0x1d8] sm:$0xff]  ;;  %v290_v60 = vld [vmem:[#allocation7 + $0x1e0] sm:$0xff] }
  0x97   : > { %323 = vst [vmem:[#allocation2 + $0xe8] sm:$0xff] %v259_v29  ;;  %387 = vst [vmem:[#allocation3 + $0xe8] sm:$0xff] %v259_v29  ;;  %v291_v61 = vld [vmem:[#allocation7 + $0x1e8] sm:$0xff]  ;;  %v292_v62 = vld [vmem:[#allocation7 + $0x1f0] sm:$0xff] }
  0x98   : > { %324 = vst [vmem:[#allocation2 + $0xf0] sm:$0xff] %v260_v30  ;;  %388 = vst [vmem:[#allocation3 + $0xf0] sm:$0xff] %v260_v30  ;;  %v293_v63 = vld [vmem:[#allocation7 + $0x1f8] sm:$0xff] }
  0x99   : > { %325 = vst [vmem:[#allocation2 + $0xf8] sm:$0xff] %v261_v31  ;;  %389 = vst [vmem:[#allocation3 + $0xf8] sm:$0xff] %v261_v31 }
  0x9a   : > { %326 = vst [vmem:[#allocation2 + $0x100] sm:$0xff] %v262_v32  ;;  %390 = vst [vmem:[#allocation3 + $0x100] sm:$0xff] %v262_v32 }
  0x9b   : > { %327 = vst [vmem:[#allocation2 + $0x108] sm:$0xff] %v263_v33  ;;  %391 = vst [vmem:[#allocation3 + $0x108] sm:$0xff] %v263_v33 }
  0x9c   : > { %328 = vst [vmem:[#allocation2 + $0x110] sm:$0xff] %v264_v34  ;;  %392 = vst [vmem:[#allocation3 + $0x110] sm:$0xff] %v264_v34 }
  0x9d   : > { %329 = vst [vmem:[#allocation2 + $0x118] sm:$0xff] %v265_v35  ;;  %393 = vst [vmem:[#allocation3 + $0x118] sm:$0xff] %v265_v35 }
  0x9e   : > { %330 = vst [vmem:[#allocation2 + $0x120] sm:$0xff] %v266_v36  ;;  %394 = vst [vmem:[#allocation3 + $0x120] sm:$0xff] %v266_v36 }
  0x9f   : > { %331 = vst [vmem:[#allocation2 + $0x128] sm:$0xff] %v267_v37  ;;  %395 = vst [vmem:[#allocation3 + $0x128] sm:$0xff] %v267_v37 }
  0xa0   : > { %332 = vst [vmem:[#allocation2 + $0x130] sm:$0xff] %v268_v38  ;;  %396 = vst [vmem:[#allocation3 + $0x130] sm:$0xff] %v268_v38 }
  0xa1   : > { %333 = vst [vmem:[#allocation2 + $0x138] sm:$0xff] %v269_v39  ;;  %397 = vst [vmem:[#allocation3 + $0x138] sm:$0xff] %v269_v39 }
  0xa2   : > { %334 = vst [vmem:[#allocation2 + $0x140] sm:$0xff] %v270_v40  ;;  %398 = vst [vmem:[#allocation3 + $0x140] sm:$0xff] %v270_v40 }
  0xa3   : > { %335 = vst [vmem:[#allocation2 + $0x148] sm:$0xff] %v271_v41  ;;  %399 = vst [vmem:[#allocation3 + $0x148] sm:$0xff] %v271_v41 }
  0xa4   : > { %336 = vst [vmem:[#allocation2 + $0x150] sm:$0xff] %v272_v42  ;;  %400 = vst [vmem:[#allocation3 + $0x150] sm:$0xff] %v272_v42 }
  0xa5   : > { %337 = vst [vmem:[#allocation2 + $0x158] sm:$0xff] %v273_v43  ;;  %401 = vst [vmem:[#allocation3 + $0x158] sm:$0xff] %v273_v43 }
  0xa6   : > { %338 = vst [vmem:[#allocation2 + $0x160] sm:$0xff] %v274_v44  ;;  %402 = vst [vmem:[#allocation3 + $0x160] sm:$0xff] %v274_v44 }
  0xa7   : > { %339 = vst [vmem:[#allocation2 + $0x168] sm:$0xff] %v275_v45  ;;  %403 = vst [vmem:[#allocation3 + $0x168] sm:$0xff] %v275_v45 }
  0xa8   : > { %340 = vst [vmem:[#allocation2 + $0x170] sm:$0xff] %v276_v46  ;;  %404 = vst [vmem:[#allocation3 + $0x170] sm:$0xff] %v276_v46 }
  0xa9   : > { %341 = vst [vmem:[#allocation2 + $0x178] sm:$0xff] %v277_v47  ;;  %405 = vst [vmem:[#allocation3 + $0x178] sm:$0xff] %v277_v47 }
  0xaa   : > { %342 = vst [vmem:[#allocation2 + $0x180] sm:$0xff] %v278_v48  ;;  %406 = vst [vmem:[#allocation3 + $0x180] sm:$0xff] %v278_v48 }
  0xab   : > { %343 = vst [vmem:[#allocation2 + $0x188] sm:$0xff] %v279_v49  ;;  %407 = vst [vmem:[#allocation3 + $0x188] sm:$0xff] %v279_v49 }
  0xac   : > { %344 = vst [vmem:[#allocation2 + $0x190] sm:$0xff] %v280_v50  ;;  %408 = vst [vmem:[#allocation3 + $0x190] sm:$0xff] %v280_v50 }
  0xad   : > { %345 = vst [vmem:[#allocation2 + $0x198] sm:$0xff] %v281_v51  ;;  %409 = vst [vmem:[#allocation3 + $0x198] sm:$0xff] %v281_v51 }
  0xae   : > { %346 = vst [vmem:[#allocation2 + $0x1a0] sm:$0xff] %v282_v52  ;;  %410 = vst [vmem:[#allocation3 + $0x1a0] sm:$0xff] %v282_v52 }
  0xaf   : > { %347 = vst [vmem:[#allocation2 + $0x1a8] sm:$0xff] %v283_v53  ;;  %411 = vst [vmem:[#allocation3 + $0x1a8] sm:$0xff] %v283_v53 }
  0xb0   : > { %348 = vst [vmem:[#allocation2 + $0x1b0] sm:$0xff] %v284_v54  ;;  %412 = vst [vmem:[#allocation3 + $0x1b0] sm:$0xff] %v284_v54 }
  0xb1   : > { %349 = vst [vmem:[#allocation2 + $0x1b8] sm:$0xff] %v285_v55  ;;  %413 = vst [vmem:[#allocation3 + $0x1b8] sm:$0xff] %v285_v55 }
  0xb2   : > { %350 = vst [vmem:[#allocation2 + $0x1c0] sm:$0xff] %v286_v56  ;;  %414 = vst [vmem:[#allocation3 + $0x1c0] sm:$0xff] %v286_v56 }
  0xb3   : > { %351 = vst [vmem:[#allocation2 + $0x1c8] sm:$0xff] %v287_v57  ;;  %415 = vst [vmem:[#allocation3 + $0x1c8] sm:$0xff] %v287_v57 }
  0xb4   : > { %352 = vst [vmem:[#allocation2 + $0x1d0] sm:$0xff] %v288_v58  ;;  %416 = vst [vmem:[#allocation3 + $0x1d0] sm:$0xff] %v288_v58 }
  0xb5   : > { %353 = vst [vmem:[#allocation2 + $0x1d8] sm:$0xff] %v289_v59  ;;  %417 = vst [vmem:[#allocation3 + $0x1d8] sm:$0xff] %v289_v59 }
  0xb6   : > { %354 = vst [vmem:[#allocation2 + $0x1e0] sm:$0xff] %v290_v60  ;;  %418 = vst [vmem:[#allocation3 + $0x1e0] sm:$0xff] %v290_v60 }
  0xb7   : > { %355 = vst [vmem:[#allocation2 + $0x1e8] sm:$0xff] %v291_v61  ;;  %419 = vst [vmem:[#allocation3 + $0x1e8] sm:$0xff] %v291_v61 }
  0xb8   : > { %356 = vst [vmem:[#allocation2 + $0x1f0] sm:$0xff] %v292_v62  ;;  %420 = vst [vmem:[#allocation3 + $0x1f0] sm:$0xff] %v292_v62 }
  0xb9   : > { %357 = vst [vmem:[#allocation2 + $0x1f8] sm:$0xff] %v293_v63  ;;  %421 = vst [vmem:[#allocation3 + $0x1f8] sm:$0xff] %v293_v63 }
  0xba PF: > { %p422_p0 = scmp.lt.s32.totalorder %s1925_s17, 0  ;;  %s423_s25 = ssub.s32 0, %s1925_s17  ;;  %v1695_v0 = vld [vmem:[%s2171_s21 + $0x4] ss:$8 sps:$4 sm:$0xff]   ;;  %v1693_v50 = vld [vmem:[%s2171_s21] ss:$8 sps:$4 sm:$0xff]  }
  0xbb   : > { %s1379_s7 = smin.u32 %s1925_s17, %s423_s25  ;;  %s434_s30 = sadd.s32 1, %s1925_s17  ;;  %v1698_v1 = vld [vmem:[%s2171_s21 + $0x84] ss:$8 sps:$4 sm:$0xff]   ;;  %726 = vmatprep.mubr.bf16.mxu0 %v1695_v0  ;;  %v1696_v51 = vld [vmem:[%s2171_s21 + $0x80] ss:$8 sps:$4 sm:$0xff]  }
  0xbc   : > { %s425_s8 = sand.u32 1, %s1379_s7   ;;  %s436_s23 = ssub.s32 0, %s434_s30  ;;  %790 = vmatprep.mubr.bf16.mxu1 %v1698_v1  ;;  %v1699_v52 = vld [vmem:[%s2171_s21 + $0x14] ss:$8 sps:$4 sm:$0xff]   ;;  %v1703_v54 = vld [vmem:[%s2171_s21 + $0x10] ss:$8 sps:$4 sm:$0xff]  }
  0xbd   : > { %s426_s22 = ssub.s32 0, %s425_s8  ;;  %p435_p5 = scmp.lt.s32.totalorder %s434_s30, 0  ;;  %v1701_v53 = vld [vmem:[%s2171_s21 + $0x94] ss:$8 sps:$4 sm:$0xff]   ;;  %v1704_v55 = vld [vmem:[%s2171_s21 + $0x90] ss:$8 sps:$4 sm:$0xff]  }
  0xbe   : > { %s2804_s22 = smov (!%p422_p0, %s426_s22), %s425_s8  ;;  %s1382_s27 = smin.u32 %s436_s23, %s434_s30  ;;  %v1705_v56 = vld [vmem:[%s2171_s21 + $0x24] ss:$8 sps:$4 sm:$0xff]   ;;  %v1709_v58 = vld [vmem:[%s2171_s21 + $0x20] ss:$8 sps:$4 sm:$0xff]   ;;  %v1711_v60 = vld [vmem:[%s2171_s21 + $0x34] ss:$8 sps:$4 sm:$0xff]  }
  0xbf   : > { %p1381_p9 = scmp.lt.s32.totalorder %s2804_s22, 0  ;;  %s432_s6 = sadd.s32 2, %s2804_s22  ;;  %v1707_v57 = vld [vmem:[%s2171_s21 + $0xa4] ss:$8 sps:$4 sm:$0xff]   ;;  %v1710_v59 = vld [vmem:[%s2171_s21 + $0xa0] ss:$8 sps:$4 sm:$0xff]  }
  0xc0   : > { %s438_s26 = sand.u32 1, %s1382_s27   ;;  %s1386_s12 = sshll.u32 %s1917_s15, 8  ;;  %v1713_v61 = vld [vmem:[%s2171_s21 + $0xb4] ss:$8 sps:$4 sm:$0xff]   ;;  %v1715_v62 = vld [vmem:[%s2171_s21 + $0x30] ss:$8 sps:$4 sm:$0xff]  }
  0xc1   : > { %s2806_s6 = smov (!%p1381_p9, %s432_s6), %s2804_s22  ;;  %s439_s5 = ssub.s32 0, %s438_s26  ;;  %v1716_v63 = vld [vmem:[%s2171_s21 + $0xb0] ss:$8 sps:$4 sm:$0xff]   ;;  %v1717_v0 = vld [vmem:[%s2171_s21 + $0x44] ss:$8 sps:$4 sm:$0xff]  }
  0xc2   : > { %s2808_s5 = smov (!%p435_p5, %s439_s5), %s438_s26  ;;  %s1385_s17 = sshll.u32 %s2806_s6, 9  ;;  %v1719_v1 = vld [vmem:[%s2171_s21 + $0xc4] ss:$8 sps:$4 sm:$0xff]  }
  0xc3   : > { %p1384_p13 = scmp.lt.s32.totalorder %s2808_s5, 0  ;;  %s445_s24 = sadd.s32 2, %s2808_s5 }
  0xc4   : > { %s449_s2 = sadd.s32 %s1386_s12, %s1385_s17  ;;  %s1388_s9 = sshll.u32 %s1921_s16, 8 }
  0xc5   : > { %s2810_s24 = smov (!%p1384_p13, %s445_s24), %s2808_s5  ;;  %s2199_s3 = scalar_lea.vmem [#allocation2], %s449_s2 }
  0xc6   : > { %s1387_s20 = sshll.u32 %s2810_s24, 9  ;;  %v502_v2 = vld [vmem:[%s2199_s3 + $0x80] sm:$0xff]  ;;  %v503_v3 = vld [vmem:[%s2199_s3 + $0x88] sm:$0xff]  ;;  %v504_v7 = vld [vmem:[%s2199_s3 + $0x90] sm:$0xff]  ;;  %p1421_p1 = scmp.ne.s32.totalorder %s1917_s15, 0 }
  0xc7   : > { %v486_v4 = vld [vmem:[%s2199_s3] sm:$0xff]  ;;  %s2206_s25 = sadd.s32 %s1388_s9, %s1387_s20  ;;  %v526_v5 = vpack.c.bf16 %v503_v3, %v502_v2  ;;  %v487_v6 = vld [vmem:[%s2199_s3 + $0x8] sm:$0xff]  ;;  %v505_v8 = vld [vmem:[%s2199_s3 + $0x98] sm:$0xff] }
  0xc8   : > { %v518_v9 = vpack.c.bf16 %v487_v6, %v486_v4  ;;  %v527_v10 = vpack.c.bf16 %v505_v8, %v504_v7  ;;  %v488_v11 = vld [vmem:[%s2199_s3 + $0x10] sm:$0xff]  ;;  %v489_v12 = vld [vmem:[%s2199_s3 + $0x18] sm:$0xff]  ;;  %v506_v13 = vld [vmem:[%s2199_s3 + $0xa0] sm:$0xff] }
  0xc9   : > { %1431 = vmatprep.subr.bf16.mxu0 %v526_v5  ;;  %1543 = vmatprep.subr.bf16.mxu1 %v526_v5  ;;  %v507_v14 = vld [vmem:[%s2199_s3 + $0xa8] sm:$0xff]  ;;  %v519_v15 = vpack.c.bf16 %v489_v12, %v488_v11  ;;  %v490_v17 = vld [vmem:[%s2199_s3 + $0x20] sm:$0xff]  ;;  %v508_v19 = vld [vmem:[%s2199_s3 + $0xb0] sm:$0xff] }
  0xca   : > { %1432 = vmatpush3.bf16.msra.mxu0 %v518_v9  ;;  %1551 = vmatpush3.bf16.msra.mxu1 %v518_v9  ;;  %v528_v16 = vpack.c.bf16 %v507_v14, %v506_v13  ;;  %v491_v18 = vld [vmem:[%s2199_s3 + $0x28] sm:$0xff]  ;;  %v509_v20 = vld [vmem:[%s2199_s3 + $0xb8] sm:$0xff]  ;;  %v492_v23 = vld [vmem:[%s2199_s3 + $0x30] sm:$0xff] }
  0xcb   : > { %1433 = vmatprep.subr.bf16.mxu0 %v527_v10  ;;  %1544 = vmatprep.subr.bf16.mxu1 %v527_v10  ;;  %v520_v21 = vpack.c.bf16 %v491_v18, %v490_v17  ;;  %v529_v22 = vpack.c.bf16 %v509_v20, %v508_v19  ;;  %v493_v24 = vld [vmem:[%s2199_s3 + $0x38] sm:$0xff]  ;;  %v510_v25 = vld [vmem:[%s2199_s3 + $0xc0] sm:$0xff]  ;;  %v511_v26 = vld [vmem:[%s2199_s3 + $0xc8] sm:$0xff] }
  0xcc   : > { %v521_v27 = vpack.c.bf16 %v493_v24, %v492_v23  ;;  %v494_v28 = vld [vmem:[%s2199_s3 + $0x40] sm:$0xff]  ;;  %v530_v29 = vpack.c.bf16 %v511_v26, %v510_v25  ;;  %v495_v30 = vld [vmem:[%s2199_s3 + $0x48] sm:$0xff]  ;;  %v512_v31 = vld [vmem:[%s2199_s3 + $0xd0] sm:$0xff] }
  0xcd   : > { %v513_v32 = vld [vmem:[%s2199_s3 + $0xd8] sm:$0xff]  ;;  %v522_v33 = vpack.c.bf16 %v495_v30, %v494_v28  ;;  %v496_v35 = vld [vmem:[%s2199_s3 + $0x50] sm:$0xff]  ;;  %v514_v37 = vld [vmem:[%s2199_s3 + $0xe0] sm:$0xff] }
  0xce   : > { %1434 = vmatpush3.bf16.msra.mxu0 %v519_v15  ;;  %1552 = vmatpush3.bf16.msra.mxu1 %v519_v15  ;;  %v531_v34 = vpack.c.bf16 %v513_v32, %v512_v31  ;;  %v497_v36 = vld [vmem:[%s2199_s3 + $0x58] sm:$0xff]  ;;  %v515_v38 = vld [vmem:[%s2199_s3 + $0xe8] sm:$0xff]  ;;  %v498_v41 = vld [vmem:[%s2199_s3 + $0x60] sm:$0xff] }
  0xcf   : > { %1435 = vmatprep.subr.bf16.mxu0 %v528_v16  ;;  %1545 = vmatprep.subr.bf16.mxu1 %v528_v16  ;;  %v523_v39 = vpack.c.bf16 %v497_v36, %v496_v35  ;;  %v532_v40 = vpack.c.bf16 %v515_v38, %v514_v37  ;;  %v499_v42 = vld [vmem:[%s2199_s3 + $0x68] sm:$0xff]  ;;  %v516_v43 = vld [vmem:[%s2199_s3 + $0xf0] sm:$0xff]  ;;  %v517_v44 = vld [vmem:[%s2199_s3 + $0xf8] sm:$0xff] }
  0xd0   : > { %v524_v45 = vpack.c.bf16 %v499_v42, %v498_v41  ;;  %v533_v46 = vpack.c.bf16 %v517_v44, %v516_v43  ;;  %v500_v47 = vld [vmem:[%s2199_s3 + $0x70] sm:$0xff]  ;;  %v501_v48 = vld [vmem:[%s2199_s3 + $0x78] sm:$0xff]  ;;  %v1721_v2 = vld [vmem:[%s2171_s21 + $0x40] ss:$8 sps:$4 sm:$0xff]  }
  0xd1   : > { %v525_v49 = vpack.c.bf16 %v501_v48, %v500_v47  ;;  %v1722_v3 = vld [vmem:[%s2171_s21 + $0xc0] ss:$8 sps:$4 sm:$0xff]   ;;  %v1723_v4 = vld [vmem:[%s2171_s21 + $0x54] ss:$8 sps:$4 sm:$0xff]   ;;  %v1727_v6 = vld [vmem:[%s2171_s21 + $0x50] ss:$8 sps:$4 sm:$0xff]  }
  0xd2   : > { %1436 = vmatpush3.bf16.msra.mxu0 %v520_v21  ;;  %1553 = vmatpush3.bf16.msra.mxu1 %v520_v21  ;;  %v1725_v5 = vld [vmem:[%s2171_s21 + $0xd4] ss:$8 sps:$4 sm:$0xff]   ;;  %v1728_v7 = vld [vmem:[%s2171_s21 + $0xd0] ss:$8 sps:$4 sm:$0xff]   ;;  %v1729_v8 = vld [vmem:[%s2171_s21 + $0x64] ss:$8 sps:$4 sm:$0xff]  }
  0xd3   : > { %1437 = vmatprep.subr.bf16.mxu0 %v529_v22  ;;  %1546 = vmatprep.subr.bf16.mxu1 %v529_v22  ;;  %v1731_v9 = vld [vmem:[%s2171_s21 + $0xe4] ss:$8 sps:$4 sm:$0xff]   ;;  %v1733_v10 = vld [vmem:[%s2171_s21 + $0x60] ss:$8 sps:$4 sm:$0xff]   ;;  %v1735_v12 = vld [vmem:[%s2171_s21 + $0x74] ss:$8 sps:$4 sm:$0xff]  }
  0xd4   : > { %v1734_v11 = vld [vmem:[%s2171_s21 + $0xe0] ss:$8 sps:$4 sm:$0xff]   ;;  %v1737_v13 = vld [vmem:[%s2171_s21 + $0xf4] ss:$8 sps:$4 sm:$0xff]   ;;  %v1739_v14 = vld [vmem:[%s2171_s21 + $0x70] ss:$8 sps:$4 sm:$0xff]  }
  0xd5   : > { %v1740_v15 = vld [vmem:[%s2171_s21 + $0xf0] ss:$8 sps:$4 sm:$0xff]   ;;  %s2333_s21 = scalar_lea.vmem (!%p1421_p1), [#allocation2], %s2206_s25 }
  0xd6   : > { %1438 = vmatpush3.bf16.msra.mxu0 %v521_v27  ;;  %1554 = vmatpush3.bf16.msra.mxu1 %v521_v27 }
  0xd7   : > { %1439 = vmatprep.subr.bf16.mxu0 %v530_v29  ;;  %1547 = vmatprep.subr.bf16.mxu1 %v530_v29 }
  0xda   : > { %1440 = vmatpush3.bf16.msra.mxu0 %v522_v33  ;;  %1555 = vmatpush3.bf16.msra.mxu1 %v522_v33 }
  0xdb   : > { %1441 = vmatprep.subr.bf16.mxu0 %v531_v34  ;;  %1548 = vmatprep.subr.bf16.mxu1 %v531_v34 }
  0xde   : > { %1442 = vmatpush3.bf16.msra.mxu0 %v523_v39  ;;  %1556 = vmatpush3.bf16.msra.mxu1 %v523_v39 }
  0xdf   : > { %1443 = vmatprep.subr.bf16.mxu0 %v532_v40  ;;  %1549 = vmatprep.subr.bf16.mxu1 %v532_v40 }
  0xe2   : > { %1444 = vmatpush3.bf16.msra.mxu0 %v524_v45  ;;  %1557 = vmatpush3.bf16.msra.mxu1 %v524_v45 }
  0xe3   : > { %1445 = vmatprep.subr.bf16.mxu0 %v533_v46  ;;  %1550 = vmatprep.subr.bf16.mxu1 %v533_v46 }
  0xe6   : > { %1446 = vmatpush3.bf16.msra.mxu0 %v525_v49  ;;  %1558 = vmatpush3.bf16.msra.mxu1 %v525_v49 }
  0xe9   : > { %727 = vmatmul.mubr.bf16.vlgmr.msra.gmra.mrb[0].mxu0 %v1693_v50  ;;  %791 = vmatmul.mubr.bf16.vlgmr.msra.gmra.mrb[0].mxu1 %v1696_v51 }
  0xea   : > { %734 = vmatprep.mubr.bf16.mxu0 %v1699_v52  ;;  %798 = vmatprep.mubr.bf16.mxu1 %v1701_v53 }
  0xf1   : > { %735 = vmatmul.mubr.bf16.gmra.mrb[4].mxu0 %v1703_v54  ;;  %799 = vmatmul.mubr.bf16.gmra.mrb[4].mxu1 %v1704_v55 }
  0xf2   : > { %742 = vmatprep.mubr.bf16.mxu0 %v1705_v56  ;;  %806 = vmatprep.mubr.bf16.mxu1 %v1707_v57 }
  0xf9   : > { %743 = vmatmul.mubr.bf16.gmra.mrb[8].mxu0 %v1709_v58  ;;  %807 = vmatmul.mubr.bf16.gmra.mrb[8].mxu1 %v1710_v59 }
  0xfa   : > { %750 = vmatprep.mubr.bf16.mxu0 %v1711_v60  ;;  %814 = vmatprep.mubr.bf16.mxu1 %v1713_v61 }
 0x101   : > { %751 = vmatmul.mubr.bf16.gmra.mrb[12].mxu0 %v1715_v62  ;;  %815 = vmatmul.mubr.bf16.gmra.mrb[12].mxu1 %v1716_v63 }
 0x102   : > { %758 = vmatprep.mubr.bf16.mxu0 %v1717_v0  ;;  %822 = vmatprep.mubr.bf16.mxu1 %v1719_v1 }
 0x109   : > { %759 = vmatmul.mubr.bf16.gmra.mrb[16].mxu0 %v1721_v2  ;;  %823 = vmatmul.mubr.bf16.gmra.mrb[16].mxu1 %v1722_v3 }
 0x10a   : > { %766 = vmatprep.mubr.bf16.mxu0 %v1723_v4  ;;  %830 = vmatprep.mubr.bf16.mxu1 %v1725_v5 }
 0x111   : > { %767 = vmatmul.mubr.bf16.gmra.mrb[20].mxu0 %v1727_v6  ;;  %831 = vmatmul.mubr.bf16.gmra.mrb[20].mxu1 %v1728_v7 }
 0x112   : > { %774 = vmatprep.mubr.bf16.mxu0 %v1729_v8  ;;  %838 = vmatprep.mubr.bf16.mxu1 %v1731_v9 }
 0x119   : > { %775 = vmatmul.mubr.bf16.gmra.mrb[24].mxu0 %v1733_v10  ;;  %839 = vmatmul.mubr.bf16.gmra.mrb[24].mxu1 %v1734_v11 }
 0x11a   : > { %782 = vmatprep.mubr.bf16.mxu0 %v1735_v12  ;;  %846 = vmatprep.mubr.bf16.mxu1 %v1737_v13 }
 0x121   : > { %783 = vmatmul.mubr.bf16.gmra.mrb[28].mxu0 %v1739_v14  ;;  %847 = vmatmul.mubr.bf16.gmra.mrb[28].mxu1 %v1740_v15 }
 0x1bc   : > { %v1447_v16 = vpop.f32.mrb[0].mxu0  ;;  %v1495_v17 = vpop.f32.mrb[0].mxu1 }
 0x1bd   : > { %v1448_v18 = vpop.f32.mrb[1].mxu0  ;;  %v1496_v19 = vpop.f32.mrb[1].mxu1 }
 0x1be   : > { %v2267_v20 = vadd.f32 %v1448_v18, %v1447_v16  ;;  %v2269_v21 = vadd.f32 %v1496_v19, %v1495_v17  ;;  %v1450_v22 = vpop.f32.mrb[2].mxu0  ;;  %v1498_v23 = vpop.f32.mrb[2].mxu1 }
 0x1bf   : > { %v1451_v24 = vpop.f32.mrb[3].mxu0  ;;  %v1499_v25 = vpop.f32.mrb[3].mxu1 }
 0x1c0   : > { %v2271_v26 = vadd.f32 %v1451_v24, %v1450_v22  ;;  %v2273_v27 = vadd.f32 %v1499_v25, %v1498_v23  ;;  %859 = vst [vmem:[%s2333_s21] sm:$0xff] (!%p1421_p1), %v2267_v20  ;;  %875 = vst [vmem:[%s2333_s21 + $0x80] sm:$0xff] (!%p1421_p1), %v2269_v21 }
 0x1c2   : > { %860 = vst [vmem:[%s2333_s21 + $0x8] sm:$0xff] (!%p1421_p1), %v2271_v26  ;;  %876 = vst [vmem:[%s2333_s21 + $0x88] sm:$0xff] (!%p1421_p1), %v2273_v27 }
 0x1c4   : > { %v1453_v28 = vpop.f32.mrb[4].mxu0  ;;  %v1501_v29 = vpop.f32.mrb[4].mxu1 }
 0x1c5   : > { %v1454_v30 = vpop.f32.mrb[5].mxu0  ;;  %v1502_v31 = vpop.f32.mrb[5].mxu1 }
 0x1c6   : > { %v2275_v32 = vadd.f32 %v1454_v30, %v1453_v28  ;;  %v2277_v33 = vadd.f32 %v1502_v31, %v1501_v29  ;;  %v1456_v34 = vpop.f32.mrb[6].mxu0  ;;  %v1504_v35 = vpop.f32.mrb[6].mxu1 }
 0x1c7   : > { %v1457_v36 = vpop.f32.mrb[7].mxu0  ;;  %v1505_v37 = vpop.f32.mrb[7].mxu1 }
 0x1c8   : > { %v2279_v38 = vadd.f32 %v1457_v36, %v1456_v34  ;;  %v2281_v39 = vadd.f32 %v1505_v37, %v1504_v35  ;;  %861 = vst [vmem:[%s2333_s21 + $0x10] sm:$0xff] (!%p1421_p1), %v2275_v32  ;;  %877 = vst [vmem:[%s2333_s21 + $0x90] sm:$0xff] (!%p1421_p1), %v2277_v33 }
 0x1ca   : > { %862 = vst [vmem:[%s2333_s21 + $0x18] sm:$0xff] (!%p1421_p1), %v2279_v38  ;;  %878 = vst [vmem:[%s2333_s21 + $0x98] sm:$0xff] (!%p1421_p1), %v2281_v39 }
 0x1cc   : > { %v1459_v40 = vpop.f32.mrb[8].mxu0  ;;  %v1507_v41 = vpop.f32.mrb[8].mxu1 }
 0x1cd   : > { %v1460_v42 = vpop.f32.mrb[9].mxu0  ;;  %v1508_v43 = vpop.f32.mrb[9].mxu1 }
 0x1ce   : > { %v2283_v44 = vadd.f32 %v1460_v42, %v1459_v40  ;;  %v2285_v45 = vadd.f32 %v1508_v43, %v1507_v41  ;;  %v1462_v46 = vpop.f32.mrb[10].mxu0  ;;  %v1510_v47 = vpop.f32.mrb[10].mxu1 }
 0x1cf   : > { %v1463_v48 = vpop.f32.mrb[11].mxu0  ;;  %v1511_v49 = vpop.f32.mrb[11].mxu1 }
 0x1d0   : > { %v2287_v50 = vadd.f32 %v1463_v48, %v1462_v46  ;;  %v2289_v51 = vadd.f32 %v1511_v49, %v1510_v47  ;;  %863 = vst [vmem:[%s2333_s21 + $0x20] sm:$0xff] (!%p1421_p1), %v2283_v44  ;;  %879 = vst [vmem:[%s2333_s21 + $0xa0] sm:$0xff] (!%p1421_p1), %v2285_v45 }
 0x1d2   : > { %864 = vst [vmem:[%s2333_s21 + $0x28] sm:$0xff] (!%p1421_p1), %v2287_v50  ;;  %880 = vst [vmem:[%s2333_s21 + $0xa8] sm:$0xff] (!%p1421_p1), %v2289_v51 }
 0x1d4   : > { %v1465_v52 = vpop.f32.mrb[12].mxu0  ;;  %v1513_v53 = vpop.f32.mrb[12].mxu1 }
 0x1d5   : > { %v1466_v54 = vpop.f32.mrb[13].mxu0  ;;  %v1514_v55 = vpop.f32.mrb[13].mxu1 }
 0x1d6   : > { %v2291_v56 = vadd.f32 %v1466_v54, %v1465_v52  ;;  %v2293_v57 = vadd.f32 %v1514_v55, %v1513_v53  ;;  %v1468_v58 = vpop.f32.mrb[14].mxu0  ;;  %v1516_v59 = vpop.f32.mrb[14].mxu1 }
 0x1d7   : > { %v1469_v60 = vpop.f32.mrb[15].mxu0  ;;  %v1517_v61 = vpop.f32.mrb[15].mxu1 }
 0x1d8   : > { %v2295_v62 = vadd.f32 %v1469_v60, %v1468_v58  ;;  %v2297_v63 = vadd.f32 %v1517_v61, %v1516_v59  ;;  %865 = vst [vmem:[%s2333_s21 + $0x30] sm:$0xff] (!%p1421_p1), %v2291_v56  ;;  %881 = vst [vmem:[%s2333_s21 + $0xb0] sm:$0xff] (!%p1421_p1), %v2293_v57 }
 0x1da   : > { %866 = vst [vmem:[%s2333_s21 + $0x38] sm:$0xff] (!%p1421_p1), %v2295_v62  ;;  %882 = vst [vmem:[%s2333_s21 + $0xb8] sm:$0xff] (!%p1421_p1), %v2297_v63 }
 0x1dc   : > { %v1471_v0 = vpop.f32.mrb[16].mxu0  ;;  %v1519_v1 = vpop.f32.mrb[16].mxu1 }
 0x1dd   : > { %v1472_v2 = vpop.f32.mrb[17].mxu0  ;;  %v1520_v3 = vpop.f32.mrb[17].mxu1 }
 0x1de   : > { %v2299_v4 = vadd.f32 %v1472_v2, %v1471_v0  ;;  %v2301_v5 = vadd.f32 %v1520_v3, %v1519_v1  ;;  %v1474_v6 = vpop.f32.mrb[18].mxu0  ;;  %v1522_v7 = vpop.f32.mrb[18].mxu1 }
 0x1df   : > { %v1475_v8 = vpop.f32.mrb[19].mxu0  ;;  %v1523_v9 = vpop.f32.mrb[19].mxu1 }
 0x1e0   : > { %v2303_v10 = vadd.f32 %v1475_v8, %v1474_v6  ;;  %v2305_v11 = vadd.f32 %v1523_v9, %v1522_v7  ;;  %867 = vst [vmem:[%s2333_s21 + $0x40] sm:$0xff] (!%p1421_p1), %v2299_v4  ;;  %883 = vst [vmem:[%s2333_s21 + $0xc0] sm:$0xff] (!%p1421_p1), %v2301_v5 }
 0x1e2   : > { %868 = vst [vmem:[%s2333_s21 + $0x48] sm:$0xff] (!%p1421_p1), %v2303_v10  ;;  %884 = vst [vmem:[%s2333_s21 + $0xc8] sm:$0xff] (!%p1421_p1), %v2305_v11 }
 0x1e4   : > { %v1477_v12 = vpop.f32.mrb[20].mxu0  ;;  %v1525_v13 = vpop.f32.mrb[20].mxu1 }
 0x1e5   : > { %v1478_v14 = vpop.f32.mrb[21].mxu0  ;;  %v1526_v15 = vpop.f32.mrb[21].mxu1 }
 0x1e6   : > { %v2307_v16 = vadd.f32 %v1478_v14, %v1477_v12  ;;  %v2309_v17 = vadd.f32 %v1526_v15, %v1525_v13  ;;  %v1480_v18 = vpop.f32.mrb[22].mxu0  ;;  %v1528_v19 = vpop.f32.mrb[22].mxu1 }
 0x1e7   : > { %v1481_v22 = vpop.f32.mrb[23].mxu0  ;;  %v1529_v23 = vpop.f32.mrb[23].mxu1 }
 0x1e8   : > { %v2311_v24 = vadd.f32 %v1481_v22, %v1480_v18  ;;  %v2313_v25 = vadd.f32 %v1529_v23, %v1528_v19  ;;  %869 = vst [vmem:[%s2333_s21 + $0x50] sm:$0xff] (!%p1421_p1), %v2307_v16  ;;  %885 = vst [vmem:[%s2333_s21 + $0xd0] sm:$0xff] (!%p1421_p1), %v2309_v17 }
 0x1ea   : > { %870 = vst [vmem:[%s2333_s21 + $0x58] sm:$0xff] (!%p1421_p1), %v2311_v24  ;;  %886 = vst [vmem:[%s2333_s21 + $0xd8] sm:$0xff] (!%p1421_p1), %v2313_v25 }
 0x1ec   : > { %v1483_v28 = vpop.f32.mrb[24].mxu0  ;;  %v1531_v29 = vpop.f32.mrb[24].mxu1 }
 0x1ed   : > { %v1484_v30 = vpop.f32.mrb[25].mxu0  ;;  %v1532_v31 = vpop.f32.mrb[25].mxu1 }
 0x1ee   : > { %v2315_v34 = vadd.f32 %v1484_v30, %v1483_v28  ;;  %v2317_v35 = vadd.f32 %v1532_v31, %v1531_v29  ;;  %v1486_v36 = vpop.f32.mrb[26].mxu0  ;;  %v1534_v37 = vpop.f32.mrb[26].mxu1 }
 0x1ef   : > { %v1487_v40 = vpop.f32.mrb[27].mxu0  ;;  %v1535_v41 = vpop.f32.mrb[27].mxu1 }
 0x1f0   : > { %v2319_v42 = vadd.f32 %v1487_v40, %v1486_v36  ;;  %v2321_v43 = vadd.f32 %v1535_v41, %v1534_v37  ;;  %871 = vst [vmem:[%s2333_s21 + $0x60] sm:$0xff] (!%p1421_p1), %v2315_v34  ;;  %887 = vst [vmem:[%s2333_s21 + $0xe0] sm:$0xff] (!%p1421_p1), %v2317_v35 }
 0x1f2   : > { %857 = sbr.rel (%p1421_p1) target bundleno = 507 (0x1fb), region = 44  ;;  %872 = vst [vmem:[%s2333_s21 + $0x68] sm:$0xff] (!%p1421_p1), %v2319_v42  ;;  %888 = vst [vmem:[%s2333_s21 + $0xe8] sm:$0xff] (!%p1421_p1), %v2321_v43 }
 0x1f4   : > { %v1489_v46 = vpop.f32.mrb[28].mxu0  ;;  %v1537_v47 = vpop.f32.mrb[28].mxu1 }
 0x1f5   : > { %v1490_v48 = vpop.f32.mrb[29].mxu0  ;;  %v1538_v49 = vpop.f32.mrb[29].mxu1 }
 0x1f6   : > { %v2323_v52 = vadd.f32 %v1490_v48, %v1489_v46  ;;  %v2325_v53 = vadd.f32 %v1538_v49, %v1537_v47  ;;  %v1492_v54 = vpop.f32.mrb[30].mxu0  ;;  %v1540_v55 = vpop.f32.mrb[30].mxu1 }
 0x1f7   : > { %v1493_v58 = vpop.f32.mrb[31].mxu0  ;;  %v1541_v59 = vpop.f32.mrb[31].mxu1 }
 0x1f8   : > { %v2327_v60 = vadd.f32 %v1493_v58, %v1492_v54  ;;  %v2329_v61 = vadd.f32 %v1541_v59, %v1540_v55  ;;  %873 = vst [vmem:[%s2333_s21 + $0x70] sm:$0xff] (!%p1421_p1), %v2323_v52  ;;  %889 = vst [vmem:[%s2333_s21 + $0xf0] sm:$0xff] (!%p1421_p1), %v2325_v53 }
 0x1fa   : > { %874 = vst [vmem:[%s2333_s21 + $0x78] sm:$0xff] %v2327_v60  ;;  %890 = vst [vmem:[%s2333_s21 + $0xf8] sm:$0xff] %v2329_v61 }
 0x1fb PF: > { %894 = sbr.rel (%p223_p2) target bundleno = 532 (0x214), region = 48  ;;  %s2402_s7 = scalar_lea.vmem (!%p223_p2), [#allocation2], %s2206_s25 }
 0x201   : > { %v896_v0 = vld [vmem:[%s2402_s7] sm:$0xff] (!%p223_p2)  ;;  %v897_v1 = vld [vmem:[%s2402_s7 + $0x8] sm:$0xff] (!%p223_p2)  ;;  %v898_v2 = vld [vmem:[%s2402_s7 + $0x10] sm:$0xff] (!%p223_p2) }
 0x202   : > { %v928_v3 = vadd.f32 %v2267_v20, %v896_v0  ;;  %v929_v6 = vadd.f32 %v2271_v26, %v897_v1  ;;  %v930_v7 = vadd.f32 %v2275_v32, %v898_v2  ;;  %v899_v8 = vld [vmem:[%s2402_s7 + $0x18] sm:$0xff]  ;;  %v900_v9 = vld [vmem:[%s2402_s7 + $0x20] sm:$0xff]  ;;  %v901_v12 = vld [vmem:[%s2402_s7 + $0x28] sm:$0xff] }
 0x203   : > { %v931_v13 = vadd.f32 %v2279_v38, %v899_v8  ;;  %v932_v14 = vadd.f32 %v2283_v44, %v900_v9  ;;  %v933_v15 = vadd.f32 %v2287_v50, %v901_v12  ;;  %v902_v20 = vld [vmem:[%s2402_s7 + $0x30] sm:$0xff]  ;;  %v903_v18 = vld [vmem:[%s2402_s7 + $0x38] sm:$0xff]  ;;  %v904_v26 = vld [vmem:[%s2402_s7 + $0x40] sm:$0xff] }
 0x204   : > { %960 = vst [vmem:[%s2402_s7] sm:$0xff] %v928_v3  ;;  %961 = vst [vmem:[%s2402_s7 + $0x8] sm:$0xff] %v929_v6  ;;  %v934_v32 = vadd.f32 %v2291_v56, %v902_v20  ;;  %v935_v38 = vadd.f32 %v2295_v62, %v903_v18  ;;  %v936_v44 = vadd.f32 %v2299_v4, %v904_v26  ;;  %v905_v19 = vld [vmem:[%s2402_s7 + $0x48] sm:$0xff]  ;;  %v906_v50 = vld [vmem:[%s2402_s7 + $0x50] sm:$0xff] }
 0x205   : > { %962 = vst [vmem:[%s2402_s7 + $0x10] sm:$0xff] %v930_v7  ;;  %v907_v22 = vld [vmem:[%s2402_s7 + $0x58] sm:$0xff]  ;;  %963 = vst [vmem:[%s2402_s7 + $0x18] sm:$0xff] %v931_v13  ;;  %v937_v23 = vadd.f32 %v2303_v10, %v905_v19  ;;  %v938_v56 = vadd.f32 %v2307_v16, %v906_v50  ;;  %v908_v28 = vld [vmem:[%s2402_s7 + $0x60] sm:$0xff] }
 0x206   : > { %964 = vst [vmem:[%s2402_s7 + $0x20] sm:$0xff] %v932_v14  ;;  %965 = vst [vmem:[%s2402_s7 + $0x28] sm:$0xff] %v933_v15  ;;  %v939_v62 = vadd.f32 %v2311_v24, %v907_v22  ;;  %v909_v4 = vld [vmem:[%s2402_s7 + $0x68] sm:$0xff]  ;;  %v910_v29 = vld [vmem:[%s2402_s7 + $0x70] sm:$0xff]  ;;  %v940_v30 = vadd.f32 %v2315_v34, %v908_v28 }
 0x207   : > { %966 = vst [vmem:[%s2402_s7 + $0x30] sm:$0xff] %v934_v32  ;;  %967 = vst [vmem:[%s2402_s7 + $0x38] sm:$0xff] %v935_v38  ;;  %v941_v10 = vadd.f32 %v2319_v42, %v909_v4  ;;  %v942_v16 = vadd.f32 %v2323_v52, %v910_v29  ;;  %v911_v31 = vld [vmem:[%s2402_s7 + $0x78] sm:$0xff]  ;;  %v912_v24 = vld [vmem:[%s2402_s7 + $0x80] sm:$0xff] }
 0x208   : > { %968 = vst [vmem:[%s2402_s7 + $0x40] sm:$0xff] %v936_v44  ;;  %v913_v36 = vld [vmem:[%s2402_s7 + $0x88] sm:$0xff]  ;;  %969 = vst [vmem:[%s2402_s7 + $0x48] sm:$0xff] %v937_v23  ;;  %v943_v37 = vadd.f32 %v2327_v60, %v911_v31  ;;  %v944_v34 = vadd.f32 %v2269_v21, %v912_v24  ;;  %v914_v41 = vld [vmem:[%s2402_s7 + $0x90] sm:$0xff] }
 0x209   : > { %970 = vst [vmem:[%s2402_s7 + $0x50] sm:$0xff] %v938_v56  ;;  %971 = vst [vmem:[%s2402_s7 + $0x58] sm:$0xff] %v939_v62  ;;  %v945_v40 = vadd.f32 %v2273_v27, %v913_v36  ;;  %v915_v42 = vld [vmem:[%s2402_s7 + $0x98] sm:$0xff]  ;;  %v916_v46 = vld [vmem:[%s2402_s7 + $0xa0] sm:$0xff]  ;;  %v946_v47 = vadd.f32 %v2277_v33, %v914_v41 }
 0x20a   : > { %972 = vst [vmem:[%s2402_s7 + $0x60] sm:$0xff] %v940_v30  ;;  %973 = vst [vmem:[%s2402_s7 + $0x68] sm:$0xff] %v941_v10  ;;  %v947_v48 = vadd.f32 %v2281_v39, %v915_v42  ;;  %v948_v21 = vadd.f32 %v2285_v45, %v916_v46  ;;  %v917_v49 = vld [vmem:[%s2402_s7 + $0xa8] sm:$0xff]  ;;  %v918_v27 = vld [vmem:[%s2402_s7 + $0xb0] sm:$0xff] }
 0x20b   : > { %974 = vst [vmem:[%s2402_s7 + $0x70] sm:$0xff] %v942_v16  ;;  %v919_v52 = vld [vmem:[%s2402_s7 + $0xb8] sm:$0xff]  ;;  %975 = vst [vmem:[%s2402_s7 + $0x78] sm:$0xff] %v943_v37  ;;  %v949_v54 = vadd.f32 %v2289_v51, %v917_v49  ;;  %v950_v33 = vadd.f32 %v2293_v57, %v918_v27  ;;  %v920_v55 = vld [vmem:[%s2402_s7 + $0xc0] sm:$0xff] }
 0x20c   : > { %976 = vst [vmem:[%s2402_s7 + $0x80] sm:$0xff] %v944_v34  ;;  %977 = vst [vmem:[%s2402_s7 + $0x88] sm:$0xff] %v945_v40  ;;  %v951_v39 = vadd.f32 %v2297_v63, %v919_v52  ;;  %v921_v45 = vld [vmem:[%s2402_s7 + $0xc8] sm:$0xff]  ;;  %v922_v58 = vld [vmem:[%s2402_s7 + $0xd0] sm:$0xff]  ;;  %v952_v59 = vadd.f32 %v2301_v5, %v920_v55 }
 0x20d   : > { %978 = vst [vmem:[%s2402_s7 + $0x90] sm:$0xff] %v946_v47  ;;  %979 = vst [vmem:[%s2402_s7 + $0x98] sm:$0xff] %v947_v48  ;;  %v953_v51 = vadd.f32 %v2305_v11, %v921_v45  ;;  %v954_v57 = vadd.f32 %v2309_v17, %v922_v58  ;;  %v923_v60 = vld [vmem:[%s2402_s7 + $0xd8] sm:$0xff]  ;;  %v924_v63 = vld [vmem:[%s2402_s7 + $0xe0] sm:$0xff] }
 0x20e   : > { %980 = vst [vmem:[%s2402_s7 + $0xa0] sm:$0xff] %v948_v21  ;;  %v925_v0 = vld [vmem:[%s2402_s7 + $0xe8] sm:$0xff]  ;;  %981 = vst [vmem:[%s2402_s7 + $0xa8] sm:$0xff] %v949_v54  ;;  %v955_v1 = vadd.f32 %v2313_v25, %v923_v60  ;;  %v956_v5 = vadd.f32 %v2317_v35, %v924_v63  ;;  %v926_v11 = vld [vmem:[%s2402_s7 + $0xf0] sm:$0xff] }
 0x20f   : > { %982 = vst [vmem:[%s2402_s7 + $0xb0] sm:$0xff] %v950_v33  ;;  %983 = vst [vmem:[%s2402_s7 + $0xb8] sm:$0xff] %v951_v39  ;;  %v957_v2 = vadd.f32 %v2321_v43, %v925_v0  ;;  %v927_v3 = vld [vmem:[%s2402_s7 + $0xf8] sm:$0xff]  ;;  %v958_v17 = vadd.f32 %v2325_v53, %v926_v11 }
 0x210   : > { %984 = vst [vmem:[%s2402_s7 + $0xc0] sm:$0xff] %v952_v59  ;;  %985 = vst [vmem:[%s2402_s7 + $0xc8] sm:$0xff] %v953_v51  ;;  %v959_v6 = vadd.f32 %v2329_v61, %v927_v3 }
 0x211   : > { %986 = vst [vmem:[%s2402_s7 + $0xd0] sm:$0xff] %v954_v57  ;;  %987 = vst [vmem:[%s2402_s7 + $0xd8] sm:$0xff] %v955_v1 }
 0x212   : > { %988 = vst [vmem:[%s2402_s7 + $0xe0] sm:$0xff] %v956_v5  ;;  %989 = vst [vmem:[%s2402_s7 + $0xe8] sm:$0xff] %v957_v2 }
 0x213   : > { %990 = vst [vmem:[%s2402_s7 + $0xf0] sm:$0xff] %v958_v17  ;;  %991 = vst [vmem:[%s2402_s7 + $0xf8] sm:$0xff] %v959_v6 }
 0x214 PF: > { %p1423_p8 = scmp.ne.s32.totalorder %s1917_s15, 1 }
 0x215   : > { %s2503_s30 = scalar_lea.vmem (!%p1423_p8), [#allocation3], %s1388_s9  ;;  %s2507_s8 = scalar_lea.vmem (!%p1423_p8), [#allocation2], %s2206_s25 }
 0x216   : > { %995 = sbr.rel (%p1423_p8) target bundleno = 573 (0x23d), region = 52  ;;  %v997_v25 = vld [vmem:[%s2503_s30] sm:$0xff] (!%p1423_p8)  ;;  %v998_v43 = vld [vmem:[%s2503_s30 + $0x8] sm:$0xff] (!%p1423_p8)  ;;  %v999_v7 = vld [vmem:[%s2503_s30 + $0x10] sm:$0xff] (!%p1423_p8) }
 0x217   : > { %v1000_v13 = vld [vmem:[%s2503_s30 + $0x18] sm:$0xff] (!%p1423_p8)  ;;  %v1001_v15 = vld [vmem:[%s2503_s30 + $0x20] sm:$0xff] (!%p1423_p8)  ;;  %v1002_v26 = vld [vmem:[%s2503_s30 + $0x28] sm:$0xff] (!%p1423_p8) }
 0x218   : > { %v1003_v50 = vld [vmem:[%s2503_s30 + $0x30] sm:$0xff] (!%p1423_p8)  ;;  %v1004_v23 = vld [vmem:[%s2503_s30 + $0x38] sm:$0xff] (!%p1423_p8)  ;;  %v1005_v29 = vld [vmem:[%s2503_s30 + $0x40] sm:$0xff] (!%p1423_p8) }
 0x219   : > { %v1006_v24 = vld [vmem:[%s2503_s30 + $0x48] sm:$0xff] (!%p1423_p8)  ;;  %v1007_v37 = vld [vmem:[%s2503_s30 + $0x50] sm:$0xff] (!%p1423_p8)  ;;  %v1008_v46 = vld [vmem:[%s2503_s30 + $0x58] sm:$0xff] (!%p1423_p8) }
 0x21a   : > { %v1030_v35 = vld [vmem:[%s2507_s8] sm:$0xff] (!%p1423_p8)  ;;  %v1031_v61 = vld [vmem:[%s2507_s8 + $0x8] sm:$0xff] (!%p1423_p8)  ;;  %v1032_v8 = vld [vmem:[%s2507_s8 + $0x10] sm:$0xff] (!%p1423_p8) }
 0x21b   : > { %v1062_v53 = vadd.f32 (!%p1423_p8), %v1030_v35, %v997_v25  ;;  %v1063_v9 = vadd.f32 (!%p1423_p8), %v1031_v61, %v998_v43  ;;  %v1064_v12 = vadd.f32 (!%p1423_p8), %v1032_v8, %v999_v7  ;;  %v1033_v14 = vld [vmem:[%s2507_s8 + $0x18] sm:$0xff] (!%p1423_p8)  ;;  %v1034_v18 = vld [vmem:[%s2507_s8 + $0x20] sm:$0xff] (!%p1423_p8)  ;;  %v1035_v32 = vld [vmem:[%s2507_s8 + $0x28] sm:$0xff] (!%p1423_p8) }
 0x21c   : > { %v1065_v20 = vadd.f32 (!%p1423_p8), %v1033_v14, %v1000_v13  ;;  %v1066_v44 = vadd.f32 (!%p1423_p8), %v1034_v18, %v1001_v15  ;;  %v1067_v19 = vadd.f32 (!%p1423_p8), %v1035_v32, %v1002_v26  ;;  %v1036_v22 = vld [vmem:[%s2507_s8 + $0x30] sm:$0xff] (!%p1423_p8)  ;;  %v1037_v4 = vld [vmem:[%s2507_s8 + $0x38] sm:$0xff] (!%p1423_p8)  ;;  %v1038_v30 = vld [vmem:[%s2507_s8 + $0x40] sm:$0xff] (!%p1423_p8) }
 0x21d   : > { %1094 = vst [vmem:[%s2503_s30] sm:$0xff] %v1062_v53  ;;  %v1158_v38 = vmul.f32 0.25, %v1062_v53  ;;  %1095 = vst [vmem:[%s2503_s30 + $0x8] sm:$0xff] %v1063_v9  ;;  %v1159_v56 = vmul.f32 0.25, %v1063_v9  ;;  %v1160_v62 = vmul.f32 0.25, %v1064_v12  ;;  %v1068_v28 = vadd.f32 %v1036_v22, %v1003_v50  ;;  %v1039_v36 = vld [vmem:[%s2507_s8 + $0x48] sm:$0xff]  ;;  %v1040_v42 = vld [vmem:[%s2507_s8 + $0x50] sm:$0xff] }
 0x21e   : > { %1096 = vst [vmem:[%s2503_s30 + $0x10] sm:$0xff] %v1064_v12  ;;  %1097 = vst [vmem:[%s2503_s30 + $0x18] sm:$0xff] %v1065_v20  ;;  %v1161_v10 = vmul.f32 0.25, %v1065_v20  ;;  %v1069_v16 = vadd.f32 %v1037_v4, %v1004_v23  ;;  %v1070_v31 = vadd.f32 %v1038_v30, %v1005_v29  ;;  %v1162_v34 = vmul.f32 0.25, %v1066_v44  ;;  %v1041_v47 = vld [vmem:[%s2507_s8 + $0x58] sm:$0xff]  ;;  %v1009_v27 = vld [vmem:[%s2503_s30 + $0x60] sm:$0xff] }
 0x21f   : > { %1190 = vst [vmem:[%s2189_s28] sm:$0xff] %v1158_v38  ;;  %1098 = vst [vmem:[%s2503_s30 + $0x20] sm:$0xff] %v1066_v44  ;;  %v1163_v40 = vmul.f32 0.25, %v1067_v19  ;;  %v1071_v41 = vadd.f32 %v1039_v36, %v1006_v24  ;;  %v1164_v48 = vmul.f32 0.25, %v1068_v28  ;;  %v1072_v21 = vadd.f32 %v1040_v42, %v1007_v37  ;;  %v1042_v52 = vld [vmem:[%s2507_s8 + $0x60] sm:$0xff]  ;;  %v1010_v54 = vld [vmem:[%s2503_s30 + $0x68] sm:$0xff] }
 0x220   : > { %1099 = vst [vmem:[%s2503_s30 + $0x28] sm:$0xff] %v1067_v19  ;;  %1191 = vst [vmem:[%s2189_s28 + $0x8] sm:$0xff] %v1159_v56  ;;  %v1073_v49 = vadd.f32 %v1041_v47, %v1008_v46  ;;  %v1165_v33 = vmul.f32 0.25, %v1069_v16  ;;  %v1166_v39 = vmul.f32 0.25, %v1070_v31  ;;  %v1074_v55 = vadd.f32 %v1042_v52, %v1009_v27  ;;  %v1043_v45 = vld [vmem:[%s2507_s8 + $0x68] sm:$0xff]  ;;  %v1011_v58 = vld [vmem:[%s2503_s30 + $0x70] sm:$0xff] }
 0x221   : > { %1192 = vst [vmem:[%s2189_s28 + $0x10] sm:$0xff] %v1160_v62  ;;  %1100 = vst [vmem:[%s2503_s30 + $0x30] sm:$0xff] %v1068_v28  ;;  %v1044_v59 = vld [vmem:[%s2507_s8 + $0x70] sm:$0xff]  ;;  %v1167_v51 = vmul.f32 0.25, %v1071_v41  ;;  %v1075_v57 = vadd.f32 %v1043_v45, %v1010_v54  ;;  %v1012_v63 = vld [vmem:[%s2503_s30 + $0x78] sm:$0xff]  ;;  %v1168_v5 = vmul.f32 0.25, %v1072_v21 }
 0x222   : > { %1193 = vst [vmem:[%s2189_s28 + $0x18] sm:$0xff] %v1161_v10  ;;  %1101 = vst [vmem:[%s2503_s30 + $0x38] sm:$0xff] %v1069_v16  ;;  %v1076_v60 = vadd.f32 %v1044_v59, %v1011_v58  ;;  %v1045_v0 = vld [vmem:[%s2507_s8 + $0x78] sm:$0xff]  ;;  %v1013_v1 = vld [vmem:[%s2503_s30 + $0x80] sm:$0xff]  ;;  %v1169_v2 = vmul.f32 0.25, %v1073_v49  ;;  %v1170_v25 = vmul.f32 0.25, %v1074_v55 }
 0x223   : > { %1102 = vst [vmem:[%s2503_s30 + $0x40] sm:$0xff] %v1070_v31  ;;  %1194 = vst [vmem:[%s2189_s28 + $0x20] sm:$0xff] %v1162_v34  ;;  %v1077_v11 = vadd.f32 %v1045_v0, %v1012_v63  ;;  %v1046_v3 = vld [vmem:[%s2507_s8 + $0x80] sm:$0xff]  ;;  %v1014_v17 = vld [vmem:[%s2503_s30 + $0x88] sm:$0xff]  ;;  %v1171_v8 = vmul.f32 0.25, %v1075_v57 }
 0x224   : > { %1195 = vst [vmem:[%s2189_s28 + $0x28] sm:$0xff] %v1163_v40  ;;  %1103 = vst [vmem:[%s2503_s30 + $0x48] sm:$0xff] %v1071_v41  ;;  %v1047_v6 = vld [vmem:[%s2507_s8 + $0x88] sm:$0xff]  ;;  %v1078_v35 = vadd.f32 %v1046_v3, %v1013_v1  ;;  %v1015_v53 = vld [vmem:[%s2503_s30 + $0x90] sm:$0xff]  ;;  %v1172_v9 = vmul.f32 0.25, %v1076_v60 }
 0x225   : > { %1196 = vst [vmem:[%s2189_s28 + $0x30] sm:$0xff] %v1164_v48  ;;  %1104 = vst [vmem:[%s2503_s30 + $0x50] sm:$0xff] %v1072_v21  ;;  %v1079_v43 = vadd.f32 %v1047_v6, %v1014_v17  ;;  %v1048_v61 = vld [vmem:[%s2507_s8 + $0x90] sm:$0xff]  ;;  %v1016_v7 = vld [vmem:[%s2503_s30 + $0x98] sm:$0xff]  ;;  %v1173_v20 = vmul.f32 0.25, %v1077_v11 }
 0x226   : > { %1105 = vst [vmem:[%s2503_s30 + $0x58] sm:$0xff] %v1073_v49  ;;  %1197 = vst [vmem:[%s2189_s28 + $0x38] sm:$0xff] %v1165_v33  ;;  %v1080_v12 = vadd.f32 %v1048_v61, %v1015_v53  ;;  %v1049_v13 = vld [vmem:[%s2507_s8 + $0x98] sm:$0xff]  ;;  %v1017_v14 = vld [vmem:[%s2503_s30 + $0xa0] sm:$0xff]  ;;  %v1174_v19 = vmul.f32 0.25, %v1078_v35 }
 0x227   : > { %1198 = vst [vmem:[%s2189_s28 + $0x40] sm:$0xff] %v1166_v39  ;;  %1106 = vst [vmem:[%s2503_s30 + $0x60] sm:$0xff] %v1074_v55  ;;  %v1050_v15 = vld [vmem:[%s2507_s8 + $0xa0] sm:$0xff]  ;;  %v1081_v18 = vadd.f32 %v1049_v13, %v1016_v7  ;;  %v1018_v32 = vld [vmem:[%s2503_s30 + $0xa8] sm:$0xff]  ;;  %v1175_v50 = vmul.f32 0.25, %v1079_v43 }
 0x228   : > { %1199 = vst [vmem:[%s2189_s28 + $0x48] sm:$0xff] %v1167_v51  ;;  %1107 = vst [vmem:[%s2503_s30 + $0x68] sm:$0xff] %v1075_v57  ;;  %v1082_v26 = vadd.f32 %v1050_v15, %v1017_v14  ;;  %v1051_v38 = vld [vmem:[%s2507_s8 + $0xa8] sm:$0xff]  ;;  %v1019_v44 = vld [vmem:[%s2503_s30 + $0xb0] sm:$0xff]  ;;  %v1176_v28 = vmul.f32 0.25, %v1080_v12 }
 0x229   : > { %1108 = vst [vmem:[%s2503_s30 + $0x70] sm:$0xff] %v1076_v60  ;;  %1200 = vst [vmem:[%s2189_s28 + $0x50] sm:$0xff] %v1168_v5  ;;  %v1083_v22 = vadd.f32 %v1051_v38, %v1018_v32  ;;  %v1052_v23 = vld [vmem:[%s2507_s8 + $0xb0] sm:$0xff]  ;;  %v1020_v56 = vld [vmem:[%s2503_s30 + $0xb8] sm:$0xff]  ;;  %v1177_v31 = vmul.f32 0.25, %v1081_v18 }
 0x22a   : > { %1201 = vst [vmem:[%s2189_s28 + $0x58] sm:$0xff] %v1169_v2  ;;  %1109 = vst [vmem:[%s2503_s30 + $0x78] sm:$0xff] %v1077_v11  ;;  %v1053_v62 = vld [vmem:[%s2507_s8 + $0xb8] sm:$0xff]  ;;  %v1084_v4 = vadd.f32 %v1052_v23, %v1019_v44  ;;  %v1021_v30 = vld [vmem:[%s2503_s30 + $0xc0] sm:$0xff]  ;;  %v1178_v24 = vmul.f32 0.25, %v1082_v26 }
 0x22b   : > { %1202 = vst [vmem:[%s2189_s28 + $0x60] sm:$0xff] %v1170_v25  ;;  %1110 = vst [vmem:[%s2503_s30 + $0x80] sm:$0xff] %v1078_v35  ;;  %v1085_v29 = vadd.f32 %v1053_v62, %v1020_v56  ;;  %v1054_v10 = vld [vmem:[%s2507_s8 + $0xc0] sm:$0xff]  ;;  %v1022_v16 = vld [vmem:[%s2503_s30 + $0xc8] sm:$0xff]  ;;  %v1179_v41 = vmul.f32 0.25, %v1083_v22 }
 0x22c   : > { %1111 = vst [vmem:[%s2503_s30 + $0x88] sm:$0xff] %v1079_v43  ;;  %1203 = vst [vmem:[%s2189_s28 + $0x68] sm:$0xff] %v1171_v8  ;;  %v1086_v36 = vadd.f32 %v1054_v10, %v1021_v30  ;;  %v1055_v37 = vld [vmem:[%s2507_s8 + $0xc8] sm:$0xff]  ;;  %v1023_v34 = vld [vmem:[%s2503_s30 + $0xd0] sm:$0xff]  ;;  %v1180_v49 = vmul.f32 0.25, %v1084_v4 }
 0x22d   : > { %1204 = vst [vmem:[%s2189_s28 + $0x70] sm:$0xff] %v1172_v9  ;;  %1112 = vst [vmem:[%s2503_s30 + $0x90] sm:$0xff] %v1080_v12  ;;  %v1056_v40 = vld [vmem:[%s2507_s8 + $0xd0] sm:$0xff]  ;;  %v1087_v42 = vadd.f32 %v1055_v37, %v1022_v16  ;;  %v1024_v47 = vld [vmem:[%s2503_s30 + $0xd8] sm:$0xff]  ;;  %v1181_v27 = vmul.f32 0.25, %v1085_v29 }
 0x22e   : > { %1205 = vst [vmem:[%s2189_s28 + $0x78] sm:$0xff] %v1173_v20  ;;  %1113 = vst [vmem:[%s2503_s30 + $0x98] sm:$0xff] %v1081_v18  ;;  %v1088_v46 = vadd.f32 %v1056_v40, %v1023_v34  ;;  %v1057_v48 = vld [vmem:[%s2507_s8 + $0xd8] sm:$0xff]  ;;  %v1025_v21 = vld [vmem:[%s2503_s30 + $0xe0] sm:$0xff]  ;;  %v1182_v55 = vmul.f32 0.25, %v1086_v36 }
 0x22f   : > { %1114 = vst [vmem:[%s2503_s30 + $0xa0] sm:$0xff] %v1082_v26  ;;  %1206 = vst [vmem:[%s2189_s28 + $0x80] sm:$0xff] %v1174_v19  ;;  %v1089_v52 = vadd.f32 %v1057_v48, %v1024_v47  ;;  %v1058_v54 = vld [vmem:[%s2507_s8 + $0xe0] sm:$0xff]  ;;  %v1026_v33 = vld [vmem:[%s2503_s30 + $0xe8] sm:$0xff]  ;;  %v1183_v60 = vmul.f32 0.25, %v1087_v42 }
 0x230   : > { %1207 = vst [vmem:[%s2189_s28 + $0x88] sm:$0xff] %v1175_v50  ;;  %1115 = vst [vmem:[%s2503_s30 + $0xa8] sm:$0xff] %v1083_v22  ;;  %v1059_v39 = vld [vmem:[%s2507_s8 + $0xe8] sm:$0xff]  ;;  %v1090_v45 = vadd.f32 %v1058_v54, %v1025_v21  ;;  %v1027_v59 = vld [vmem:[%s2503_s30 + $0xf0] sm:$0xff]  ;;  %v1184_v63 = vmul.f32 0.25, %v1088_v46 }
 0x231   : > { %1208 = vst [vmem:[%s2189_s28 + $0x90] sm:$0xff] %v1176_v28  ;;  %1116 = vst [vmem:[%s2503_s30 + $0xb0] sm:$0xff] %v1084_v4  ;;  %v1091_v58 = vadd.f32 %v1059_v39, %v1026_v33  ;;  %v1060_v51 = vld [vmem:[%s2507_s8 + $0xf0] sm:$0xff]  ;;  %v1028_v57 = vld [vmem:[%s2503_s30 + $0xf8] sm:$0xff]  ;;  %v1185_v5 = vmul.f32 0.25, %v1089_v52 }
 0x232   : > { %1117 = vst [vmem:[%s2503_s30 + $0xb8] sm:$0xff] %v1085_v29  ;;  %1209 = vst [vmem:[%s2189_s28 + $0x98] sm:$0xff] %v1177_v31  ;;  %v1092_v0 = vadd.f32 %v1060_v51, %v1027_v59  ;;  %v1061_v1 = vld [vmem:[%s2507_s8 + $0xf8] sm:$0xff]  ;;  %v1186_v11 = vmul.f32 0.25, %v1090_v45 }
 0x233   : > { %1210 = vst [vmem:[%s2189_s28 + $0xa0] sm:$0xff] %v1178_v24  ;;  %1118 = vst [vmem:[%s2503_s30 + $0xc0] sm:$0xff] %v1086_v36  ;;  %v1093_v2 = vadd.f32 %v1061_v1, %v1028_v57  ;;  %v1187_v3 = vmul.f32 0.25, %v1091_v58 }
 0x234   : > { %1211 = vst [vmem:[%s2189_s28 + $0xa8] sm:$0xff] %v1179_v41  ;;  %1119 = vst [vmem:[%s2503_s30 + $0xc8] sm:$0xff] %v1087_v42  ;;  %v1188_v17 = vmul.f32 0.25, %v1092_v0 }
 0x235   : > { %1120 = vst [vmem:[%s2503_s30 + $0xd0] sm:$0xff] %v1088_v46  ;;  %1212 = vst [vmem:[%s2189_s28 + $0xb0] sm:$0xff] %v1180_v49  ;;  %v1189_v6 = vmul.f32 0.25, %v1093_v2 }
 0x236   : > { %1213 = vst [vmem:[%s2189_s28 + $0xb8] sm:$0xff] %v1181_v27  ;;  %1121 = vst [vmem:[%s2503_s30 + $0xd8] sm:$0xff] %v1089_v52 }
 0x237   : > { %1214 = vst [vmem:[%s2189_s28 + $0xc0] sm:$0xff] %v1182_v55  ;;  %1122 = vst [vmem:[%s2503_s30 + $0xe0] sm:$0xff] %v1090_v45 }
 0x238   : > { %1123 = vst [vmem:[%s2503_s30 + $0xe8] sm:$0xff] %v1091_v58  ;;  %1215 = vst [vmem:[%s2189_s28 + $0xc8] sm:$0xff] %v1183_v60 }
 0x239   : > { %1216 = vst [vmem:[%s2189_s28 + $0xd0] sm:$0xff] %v1184_v63  ;;  %1124 = vst [vmem:[%s2503_s30 + $0xf0] sm:$0xff] %v1092_v0 }
 0x23a   : > { %1217 = vst [vmem:[%s2189_s28 + $0xd8] sm:$0xff] %v1185_v5  ;;  %1125 = vst [vmem:[%s2503_s30 + $0xf8] sm:$0xff] %v1093_v2 }
 0x23b   : > { %1218 = vst [vmem:[%s2189_s28 + $0xe0] sm:$0xff] %v1186_v11  ;;  %1219 = vst [vmem:[%s2189_s28 + $0xe8] sm:$0xff] %v1187_v3 }
 0x23c   : > { %1220 = vst [vmem:[%s2189_s28 + $0xf0] sm:$0xff] %v1188_v17  ;;  %1221 = vst [vmem:[%s2189_s28 + $0xf8] sm:$0xff] %v1189_v6 }
 0x23d PF: > { %s2769_s15 = sld [smem:[#allocation17_spill]]  ;;  %s1430_s22 = sshll.u32 %s1921_s16, 12 }
 0x23e   : > { %s2770_s6 = sld [smem:[#allocation22_spill]]  ;;  %s1237_s5 = sshll.u32 %s2189_s28, 4  ;;  %s2643_s5 = int_to_ptr.vmem [resolvable:$true] %s1237_s5 }
 0x23f   : > { %s2647_s12 = scalar_lea.sflag [#allocation6], %s214_s29  ;;  %s1799_s17 = scalar_lea.vmem %s2643_s5, 4096 }
 0x240   : > { %p1800_p11 = scmp.ne.s32.totalorder %s2643_s5, %s1799_s17  ;;  %s1948_s16 = smov [#allocation9]  }
 0x241   : > { %s1803_s24 = sshll.u32 %s1948_s16, 4  ;;  %s1804_s24 = int_to_ptr.vmem [resolvable:$false] %s1803_s24 }
 0x242   : > { %s1805_s2 = scalar_lea.vmem %s1804_s24, 8192  ;;  %p1806_p3 = scmp.lt.s32.totalorder %s2643_s5, %s1804_s24 }
 0x243   : > { %p2771_p4 = scmp.ne.s32.totalorder %s2769_s15, 0  ;;  %p1807_p6 = scmp.lt.s32.totalorder %s1805_s2, %s1799_s17 }
 0x244   : > { %s2640_s26 = scalar_lea.hbm %s2770_s6, %s1430_s22 }
 0x245   : > { %p1801_p7 = pnand %p1800_p11, %p2771_p4  ;;  %p1808_p10 = por %p1807_p6, %p1806_p3 }
 0x247   : > { %p1802_p2 = pneg %p1801_p7 }
 0x249   : > { %p1809_p12 = pnand %p1808_p10, %p1802_p2 }
 0x24b   : > { %1812 = shalt.err (!%p1809_p12)
}
 0x24c   : > { %s1813_s29 = scalar_lea.hbm %s2640_s26, 4096  ;;  %s1817_s20 = scalar_lea.hbm %s2770_s6, 8192 }
 0x24d   : > { %p1814_p0 = scmp.ne.s32.totalorder %s2640_s26, %s1813_s29  ;;  %p1818_p13 = scmp.lt.u32.totalorder %s2640_s26, %s2770_s6 }
 0x24e   : > { %p1819_p1 = scmp.lt.u32.totalorder %s1817_s20, %s1813_s29  ;;  %p1821_p11 = scmp.lt.u32.totalorder %s1813_s29, %s2640_s26 }
 0x24f   : > { %p1815_p5 = pnand %p1814_p0, %p2771_p4 }
 0x250   : > { %p1820_p8 = por %p1819_p1, %p1818_p13 }
 0x251   : > { %p1816_p9 = pneg %p1815_p5 }
 0x252   : > { %p1822_p7 = por %p1821_p11, %p1820_p8 }
 0x254   : > { %p1823_p2 = pnand %p1822_p7, %p1816_p9 }
 0x256   : > { %1826 = shalt.err (!%p1823_p2)
}
 0x257   : > { %s1949_s21 = smov 128   ;;  %s1950_s7 = smov 8  }
 0x258   : > { %1565 = dma.vmem_to_hbm [thread:$0]  (%p2771_p4), %s2643_s5, 4096, %s2640_s26, %s2647_s12, %s1949_s21, %s1949_s21, %s1950_s7  }
 0x259 PF: > { %s2772_s30 = sld [smem:[#allocation16_spill]]  ;;  %s2773_s8 = sld [smem:[#allocation13_spill]] }
 0x25a   : > { %s2774_s22 = sld [smem:[#allocation18_spill]] }
 0x25f   : > { %p1582_p3 = scmp.ge.s32.totalorder %s2772_s30, 2  ;;  %s1252_s23 = sand.u32 1, %s2773_s8  }
 0x260   : > { %p2775_p6 = scmp.ne.s32.totalorder %s2774_s22, 0  ;;  %s1253_s27 = scalar_lea.sflag [#allocation6], %s1252_s23 }
 0x262   : > { %p1576_p10 = pnand %p1582_p3, %p2775_p6 }
 0x264   : > { %1888 = dma.done.wait (!%p1576_p10), %s1253_s27, 4096  }
 0x265   : > { %1890 = vsyncadd (!%p1576_p10), %s1253_s27, 4294963200  ;;  %s19_s21 = sadd.s32 1, %s2772_s30   ;;  %s2777_s15 = sld [smem:[#allocation14_spill]] }
 0x266   : > { %p2676_p12 = scmp.ge.s32.totalorder %s19_s21, 14   ;;  %s2778_s26 = sld [smem:[#allocation15_spill]] }
 0x267   : > { %s2779_s5 = sld [smem:[#allocation19_spill]]  ;;  %s2780_s24 = sld [smem:[#allocation20_spill]] }
 0x268   : > { %s2782_s9 = smov %s1897_s10  ;;  %s2783_s10 = smov %s1901_s11 }
 0x269   : > { %s2784_s11 = smov %s2129_s18  ;;  %s2785_s12 = smov %s1909_s13 }
 0x26a   : > { %s2786_s13 = smov %s1913_s14  ;;  %s2787_s14 = smov %s2124_s1 }
 0x26b   : > { %s2788_s16 = smov %s1933_s19  ;;  %s2792_s20 = smov %s2802_s4 }
 0x26c   : > { %s2789_s17 = smov %s2778_s26  ;;  %18 = sbr.rel (!%p2676_p12) target bundleno = 14 (0xe), region = 99 }
 0x26d   : > { %s2790_s18 = smov %s2779_s5  ;;  %s2791_s19 = smov %s2780_s24 }
 0x273   :  { %1258 = vsyncpa [#allocation5], 1 }
 0x274   :  { %1260 = vsyncpa [#allocation5 + $0x1], 1 }
 0x275   :  { %1261 = vsyncpa [#allocation8], 1 }
 0x276   :  { %1262 = vsyncpa [#allocation6], 1 }
 0x277   :  { %1264 = vsyncpa [#allocation6 + $0x1], 1 }

</bundles_post_ra>
